<compile_context>
chip_gen: v7x
topology: tpu7x:2x2x1
jax: 0.10.0
libtpu: 0.0.40
codegen_flags: <defaults>
</compile_context>

<pallas_src>
import functools

import jax
import jax.numpy as jnp
from jax.experimental import pallas as pl
from jax.experimental.pallas import tpu as pltpu


def _atn_fusion_kernel(x_ref, ctx_ref, wqkv_ref, wout_ref, o_ref, *,
                       heads, dim_head, num_groups, eps, approx_recip):
  f32 = jnp.float32
  cdt = jnp.bfloat16

  x = x_ref[0]        # (C, N) f32, channels-first tokens
  ctx = ctx_ref[0]    # (C, N) f32
  c, n = x.shape
  inner = heads * dim_head
  cpg = c // num_groups

  # ---- GroupNorm WITHOUT affine (gamma/beta folded into the QKV weights) ----
  def group_norm(t):
    mean = jnp.mean(t, axis=1, keepdims=True)                  # (C, 1)
    if cpg > 1:   # general group path (dead when num_groups == C)
      gi = jax.lax.broadcasted_iota(jnp.int32, (c, c), 0) // cpg
      gj = jax.lax.broadcasted_iota(jnp.int32, (c, c), 1) // cpg
      grp = (gi == gj).astype(f32)
      mean = jnp.dot(grp, mean, preferred_element_type=f32) / cpg
    d = t - mean
    var = jnp.mean(d * d, axis=1, keepdims=True)
    if cpg > 1:
      var = jnp.dot(grp, var, preferred_element_type=f32) / cpg
    return d * jax.lax.rsqrt(var + eps)

  xn = group_norm(x)
  cn = group_norm(ctx)

  # ---- single fused QKV projection (block-diagonal folded weight) ----------
  # wqkv columns: [0:C] act on GN(x) (Q rows), [C:2C] act on GN(ctx) (K,V rows),
  # column 2C is the folded bias (incl. GN beta, proj_in bias, softmax scale).
  s_in = jnp.concatenate([xn, cn], axis=0).astype(cdt)          # (2C, N) bf16
  w_qkv = wqkv_ref[:, 0:2 * c]                                  # (3*inner, 2C) bf16
  b_qkv = wqkv_ref[:, 2 * c:2 * c + 1].astype(f32)              # (3*inner, 1)
  qkv = jnp.dot(w_qkv, s_in, preferred_element_type=f32) + b_qkv  # (3*inner, N) f32

  q = qkv[0:inner, :]
  k = qkv[inner:2 * inner, :]
  v = qkv[2 * inner:3 * inner, :]

  # ---- per-head batched attention (no block-diag / iota / where filler) ----
  qh = jnp.swapaxes(q.reshape(heads, dim_head, n), 1, 2).astype(cdt)   # (h, N, d)
  kh = k.reshape(heads, dim_head, n).astype(cdt)                       # (h, d, N)
  vh = v.reshape(heads, dim_head, n).astype(cdt)                       # (h, d, N)

  sim = jnp.einsum('hid,hdj->hij', qh, kh,
                   preferred_element_type=f32)                         # (h, N, N)
  m = jnp.max(sim, axis=-1, keepdims=True)        # per-head, per-query max
  p = jnp.exp(sim - m)
  l = jnp.sum(p, axis=-1, keepdims=True)          # > 0 (contains exp(0) = 1)
  if approx_recip:
    p = p * pl.reciprocal(l, approx=True)         # EUP slot, ~2^-12 rel err
  else:
    p = p / l
  p = p.astype(cdt)
  o3 = jnp.einsum('hdj,hij->hdi', vh, p,
                  preferred_element_type=f32)                          # (h, d, N)
  attn = o3.reshape(inner, n)                                          # (inner, N)

  # ---- depth branch: x * spatial-mean(ctx) per channel ---------------------
  depth_in = x * jnp.mean(ctx, axis=1, keepdims=True)                  # (C, N)

  # ---- single fused output projection over [attn ; depth ; x] + bias ------
  s_out = jnp.concatenate([attn, depth_in, x], axis=0).astype(cdt)     # (3C, N)
  w_out = wout_ref[:, 0:3 * c]                                         # (out_C, 3C)
  b_out = wout_ref[:, 3 * c:3 * c + 1].astype(f32)                     # (out_C, 1)
  out = jnp.dot(w_out, s_out, preferred_element_type=f32) + b_out
  o_ref[0] = out.astype(o_ref.dtype)


def atn_fusion_forward(x_nchw, ctx_nchw, params, *, heads, dim_head,
                       num_groups=32, eps=1e-6, approx_recip=True):
  b, c, hh, ww = x_nchw.shape
  n = hh * ww
  inner = heads * dim_head
  out_c = params["w_f"].shape[1]
  assert inner == c, "module requires heads*dim_head == in_channel"
  assert c % num_groups == 0
  scale = float(dim_head) ** -0.5
  f32 = jnp.float32

  # ------- host-side inference-time weight folding (frozen weights) --------
  gamma_col = params["gamma"].astype(f32).T                    # (C, 1)
  beta = params["beta"].astype(f32)                            # (1, C)

  # fold GN affine + proj_in + to_q (+ softmax scale) into single weight/bias
  w_pi_g = params["w_pi"] * gamma_col                          # (C, inner)
  b_pi_g = beta @ params["w_pi"] + params["b_pi"]              # (1, inner)
  wq = (w_pi_g @ params["w_q"]) * scale
  bq = (b_pi_g @ params["w_q"]) * scale
  w_pic_g = params["w_pic"] * gamma_col
  b_pic_g = beta @ params["w_pic"] + params["b_pic"]
  wk = w_pic_g @ params["w_k"]
  bk = b_pic_g @ params["w_k"]
  wv = w_pic_g @ params["w_v"]
  bv = b_pic_g @ params["w_v"]

  # block-diagonal QKV weight: rows [Q;K;V], cols [x-cols | ctx-cols | bias]
  zc = jnp.zeros((inner, c), f32)
  w_qkv = jnp.concatenate([
      jnp.concatenate([wq.T, zc, bq.T], axis=1),
      jnp.concatenate([zc, wk.T, bk.T], axis=1),
      jnp.concatenate([zc, wv.T, bv.T], axis=1)],
      axis=0).astype(jnp.bfloat16)                             # (3*inner, 2C+1)

  # fold to_out@proj_out@fusion1, conv1@fusion2, fusion1+fusion3 + bias chain
  wo = params["w_out"] @ params["w_po"]
  bo = params["b_out"] @ params["w_po"] + params["b_po"]
  wf1 = params["w_f"][:c]
  wf2 = params["w_f"][c:2 * c]
  wf3 = params["w_f"][2 * c:]
  w_a = wo @ wf1                                               # attention branch
  w_d = params["w_c1"] @ wf2                                   # depth branch
  w_x = wf1 + wf3                                              # residual + raw x
  b_total = bo @ wf1 + params["b_c1"] @ wf2 + params["b_f"]    # (1, out_C)
  w_out_pack = jnp.concatenate([w_a.T, w_d.T, w_x.T, b_total.T],
                               axis=1).astype(jnp.bfloat16)    # (out_C, 3C+1)

  # channels-first tokens: pure reshape, no host transpose
  x = x_nchw.reshape(b, c, n)
  ctx = ctx_nchw.reshape(b, c, n)

  kernel = functools.partial(_atn_fusion_kernel, heads=heads, dim_head=dim_head,
                             num_groups=num_groups, eps=eps,
                             approx_recip=approx_recip)

  out = pl.pallas_call(
      kernel,
      out_shape=jax.ShapeDtypeStruct((b, out_c, n), x_nchw.dtype),
      grid_spec=pltpu.PrefetchScalarGridSpec(
          num_scalar_prefetch=0,
          grid=(b,),
          in_specs=[
              pl.BlockSpec((1, c, n), lambda i: (i, 0, 0)),
              pl.BlockSpec((1, c, n), lambda i: (i, 0, 0)),
              pl.BlockSpec(w_qkv.shape, lambda i: (0, 0)),
              pl.BlockSpec(w_out_pack.shape, lambda i: (0, 0)),
          ],
          out_specs=pl.BlockSpec((1, out_c, n), lambda i: (i, 0, 0))),
      compiler_params=pltpu.CompilerParams(dimension_semantics=("parallel",)),
  )(x, ctx, w_qkv, w_out_pack)

  return out.reshape(b, out_c, hh, ww)


def reference_forward(x, ctx, p, *, heads, dim_head, num_groups, eps):
  """Plain-JAX reference in (B, N, C) layout, same math as the PyTorch module."""
  def gn(t):
    b, n, c = t.shape
    cpg = c // num_groups
    tg = t.reshape(b, n, num_groups, cpg)
    mean = tg.mean(axis=(1, 3), keepdims=True)
    var = ((tg - mean) ** 2).mean(axis=(1, 3), keepdims=True)
    tn = ((tg - mean) / jnp.sqrt(var + eps)).reshape(b, n, c)
    return tn * p["gamma"] + p["beta"]

  xn, cn = gn(x), gn(ctx)
  xp = xn @ p["w_pi"] + p["b_pi"]
  cp = cn @ p["w_pic"] + p["b_pic"]
  q, k, v = xp @ p["w_q"], cp @ p["w_k"], cp @ p["w_v"]
  b, n, inner = q.shape
  d = dim_head
  qh = q.reshape(b, n, heads, d).transpose(0, 2, 1, 3)
  kh = k.reshape(b, n, heads, d).transpose(0, 2, 1, 3)
  vh = v.reshape(b, n, heads, d).transpose(0, 2, 1, 3)
  sim = jnp.einsum("bhid,bhjd->bhij", qh, kh) * (float(d) ** -0.5)
  attn = jax.nn.softmax(sim, axis=-1)
  o = jnp.einsum("bhij,bhjd->bhid", attn, vh).transpose(0, 2, 1, 3).reshape(b, n, inner)
  o = o @ p["w_out"] + p["b_out"]
  o = o @ p["w_po"] + p["b_po"]
  attention_feat = o + x
  depth = x * ctx.mean(axis=1, keepdims=True)
  depth = depth @ p["w_c1"] + p["b_c1"]
  cat = jnp.concatenate([attention_feat, depth, x], axis=-1)
  return cat @ p["w_f"] + p["b_f"]


def _check(x, ctx, params, *, heads, dim_head, num_groups, eps, out_C):
  B, C, H, W = x.shape
  out = atn_fusion_forward(x, ctx, params, heads=heads, dim_head=dim_head,
                           num_groups=num_groups, eps=eps)
  out = jax.block_until_ready(out)
  assert out.shape == (B, out_C, H, W)
  xb = jnp.transpose(x.reshape(B, C, H * W), (0, 2, 1))
  cb = jnp.transpose(ctx.reshape(B, C, H * W), (0, 2, 1))
  ref = reference_forward(xb, cb, params, heads=heads, dim_head=dim_head,
                          num_groups=num_groups, eps=eps)
  ref = jnp.transpose(ref, (0, 2, 1)).reshape(B, out_C, H, W)
  max_err = float(jnp.max(jnp.abs(out - ref)))
  assert jnp.allclose(out, ref, atol=2e-2, rtol=2e-2), f"max_err={max_err}"
  return out


if __name__ == "__main__":
  B, C, H, W = 2, 32, 8, 8
  heads, dim_head = 4, 8            # inner_dim = heads*dim_head == C (module constraint)
  out_C = 16
  num_groups, eps = 32, 1e-6
  inner = heads * dim_head

  key = jax.random.PRNGKey(0)
  ks = jax.random.split(key, 20)

  def w(k, shape, s=0.1):
    return (s * jax.random.normal(k, shape)).astype(jnp.float32)

  params = {
      "gamma": (1.0 + w(ks[0], (1, C))).astype(jnp.float32),
      "beta": w(ks[1], (1, C)),
      "w_pi": w(ks[2], (C, inner)), "b_pi": w(ks[3], (1, inner)),
      "w_pic": w(ks[4], (C, inner)), "b_pic": w(ks[5], (1, inner)),
      "w_q": w(ks[6], (inner, inner)),
      "w_k": w(ks[7], (inner, inner)),
      "w_v": w(ks[8], (inner, inner)),
      "w_out": w(ks[9], (inner, C)), "b_out": w(ks[10], (1, C)),
      # zero_module(proj_out) -> zeros, exactly as in the PyTorch __init__
      "w_po": jnp.zeros((inner, C), jnp.float32),
      "b_po": jnp.zeros((1, C), jnp.float32),
      "w_c1": w(ks[11], (C, C)), "b_c1": w(ks[12], (1, C)),
      "w_f": w(ks[13], (3 * C, out_C)), "b_f": w(ks[14], (1, out_C)),
  }

  x = jax.random.normal(ks[17], (B, C, H, W), jnp.float32)
  ctx = jax.random.normal(ks[18], (B, C, H, W), jnp.float32)

  # 1) exact module init (proj_out zeroed)
  _check(x, ctx, params, heads=heads, dim_head=dim_head,
         num_groups=num_groups, eps=eps, out_C=out_C)

  # 2) non-zero proj_out so the attention path is actually exercised and
  #    validated against the reference softmax (per-head max path).
  params2 = dict(params, w_po=w(ks[15], (inner, C)), b_po=w(ks[16], (1, C)))
  _check(x, ctx, params2, heads=heads, dim_head=dim_head,
         num_groups=num_groups, eps=eps, out_C=out_C)

  print("KERNEL_OK")
</pallas_src>

<mosaic_0001>
module attributes {stable_mosaic.version = 11 : i64} {
  func.func @_atn_fusion_kernel(%arg0: i32, %arg1: memref<1x32x64xf32, #tpu.memory_space<vmem>>, %arg2: memref<1x32x64xf32, #tpu.memory_space<vmem>>, %arg3: memref<96x65xbf16, #tpu.memory_space<vmem>>, %arg4: memref<16x97xbf16, #tpu.memory_space<vmem>>, %arg5: memref<1x16x64xf32, #tpu.memory_space<vmem>>) attributes {dimension_semantics = [#tpu.dimension_semantics<parallel>], iteration_bounds = array<i64: 2>, scalar_prefetch = 0 : i64, scratch_operands = 0 : i64, tpu.core_type = #tpu.core_type<tc>, window_params = [{transform_indices = @transform_0, window_bounds = array<i64: 1, 32, 64>}, {transform_indices = @transform_1, window_bounds = array<i64: 1, 32, 64>}, {pipeline_mode = #tpu.pipeline_mode<synchronous>, transform_indices = @transform_2, window_bounds = array<i64: 96, 65>}, {pipeline_mode = #tpu.pipeline_mode<synchronous>, transform_indices = @transform_3, window_bounds = array<i64: 16, 97>}, {transform_indices = @transform_4, window_bounds = array<i64: 1, 16, 64>}]} {
    %c0 = arith.constant 0 : index
    %c0_0 = arith.constant 0 : index
    %c0_1 = arith.constant 0 : index
    %0 = vector.load %arg1[%c0, %c0_0, %c0_1] : memref<1x32x64xf32, #tpu.memory_space<vmem>>, vector<1x32x64xf32>
    %1 = vector.shape_cast %0 : vector<1x32x64xf32> to vector<32x64xf32>
    %c0_2 = arith.constant 0 : index
    %c0_3 = arith.constant 0 : index
    %c0_4 = arith.constant 0 : index
    %2 = vector.load %arg2[%c0_2, %c0_3, %c0_4] : memref<1x32x64xf32, #tpu.memory_space<vmem>>, vector<1x32x64xf32>
    %3 = vector.shape_cast %2 : vector<1x32x64xf32> to vector<32x64xf32>
    %cst = arith.constant dense<0.000000e+00> : vector<32xf32>
    %4 = vector.multi_reduction <add>, %1, %cst [1] : vector<32x64xf32> to vector<32xf32>
    %5 = vector.shape_cast %4 : vector<32xf32> to vector<32x1xf32>
    %cst_5 = arith.constant 6.400000e+01 : f32
    %6 = vector.broadcast %cst_5 : f32 to vector<32x1xf32>
    %7 = arith.divf %5, %6 : vector<32x1xf32>
    %8 = vector.broadcast %7 : vector<32x1xf32> to vector<32x64xf32>
    %9 = arith.subf %1, %8 : vector<32x64xf32>
    %10 = arith.mulf %9, %9 : vector<32x64xf32>
    %cst_6 = arith.constant dense<0.000000e+00> : vector<32xf32>
    %11 = vector.multi_reduction <add>, %10, %cst_6 [1] : vector<32x64xf32> to vector<32xf32>
    %12 = vector.shape_cast %11 : vector<32xf32> to vector<32x1xf32>
    %cst_7 = arith.constant 6.400000e+01 : f32
    %13 = vector.broadcast %cst_7 : f32 to vector<32x1xf32>
    %14 = arith.divf %12, %13 : vector<32x1xf32>
    %cst_8 = arith.constant 9.99999997E-7 : f32
    %15 = vector.broadcast %cst_8 : f32 to vector<32x1xf32>
    %16 = arith.addf %14, %15 : vector<32x1xf32>
    %17 = math.rsqrt %16 : vector<32x1xf32>
    %18 = vector.broadcast %17 : vector<32x1xf32> to vector<32x64xf32>
    %19 = arith.mulf %9, %18 : vector<32x64xf32>
    %cst_9 = arith.constant dense<0.000000e+00> : vector<32xf32>
    %20 = vector.multi_reduction <add>, %3, %cst_9 [1] : vector<32x64xf32> to vector<32xf32>
    %21 = vector.shape_cast %20 : vector<32xf32> to vector<32x1xf32>
    %cst_10 = arith.constant 6.400000e+01 : f32
    %22 = vector.broadcast %cst_10 : f32 to vector<32x1xf32>
    %23 = arith.divf %21, %22 : vector<32x1xf32>
    %24 = vector.broadcast %23 : vector<32x1xf32> to vector<32x64xf32>
    %25 = arith.subf %3, %24 : vector<32x64xf32>
    %26 = arith.mulf %25, %25 : vector<32x64xf32>
    %cst_11 = arith.constant dense<0.000000e+00> : vector<32xf32>
    %27 = vector.multi_reduction <add>, %26, %cst_11 [1] : vector<32x64xf32> to vector<32xf32>
    %28 = vector.shape_cast %27 : vector<32xf32> to vector<32x1xf32>
    %cst_12 = arith.constant 6.400000e+01 : f32
    %29 = vector.broadcast %cst_12 : f32 to vector<32x1xf32>
    %30 = arith.divf %28, %29 : vector<32x1xf32>
    %cst_13 = arith.constant 9.99999997E-7 : f32
    %31 = vector.broadcast %cst_13 : f32 to vector<32x1xf32>
    %32 = arith.addf %30, %31 : vector<32x1xf32>
    %33 = math.rsqrt %32 : vector<32x1xf32>
    %34 = vector.broadcast %33 : vector<32x1xf32> to vector<32x64xf32>
    %35 = arith.mulf %25, %34 : vector<32x64xf32>
    %36 = tpu.concatenate %19, %35 in 0 : vector<32x64xf32>, vector<32x64xf32> -> vector<64x64xf32>
    %37 = arith.truncf %36 : vector<64x64xf32> to vector<64x64xbf16>
    %c0_14 = arith.constant 0 : index
    %c0_15 = arith.constant 0 : index
    %38 = vector.load %arg3[%c0_14, %c0_15] : memref<96x65xbf16, #tpu.memory_space<vmem>>, vector<96x64xbf16>
    %c0_16 = arith.constant 0 : index
    %c64 = arith.constant 64 : index
    %39 = vector.load %arg3[%c0_16, %c64] : memref<96x65xbf16, #tpu.memory_space<vmem>>, vector<96x1xbf16>
    %40 = arith.extf %39 : vector<96x1xbf16> to vector<96x1xf32>
    %cst_17 = arith.constant dense<0.000000e+00> : vector<96x64xf32>
    %41 = tpu.matmul %38, %37, %cst_17 {dimension_numbers = #tpu.dot_dimension_numbers<[1], [0], [0], [1], [0, 0, 1, 1], [], []>} : vector<96x64xbf16>, vector<64x64xbf16>, vector<96x64xf32> -> vector<96x64xf32>
    %42 = vector.broadcast %40 : vector<96x1xf32> to vector<96x64xf32>
    %43 = arith.addf %41, %42 : vector<96x64xf32>
    %44 = vector.extract_strided_slice %43 {offsets = [0, 0], sizes = [32, 64], strides = [1, 1]} : vector<96x64xf32> to vector<32x64xf32>
    %45 = vector.extract_strided_slice %43 {offsets = [32, 0], sizes = [32, 64], strides = [1, 1]} : vector<96x64xf32> to vector<32x64xf32>
    %46 = vector.extract_strided_slice %43 {offsets = [64, 0], sizes = [32, 64], strides = [1, 1]} : vector<96x64xf32> to vector<32x64xf32>
    %47 = vector.shape_cast %44 : vector<32x64xf32> to vector<4x8x64xf32>
    %48 = tpu.transpose %47, [0, 2, 1] : vector<4x8x64xf32> -> vector<4x64x8xf32>
    %49 = arith.truncf %48 : vector<4x64x8xf32> to vector<4x64x8xbf16>
    %50 = vector.shape_cast %45 : vector<32x64xf32> to vector<4x8x64xf32>
    %51 = arith.truncf %50 : vector<4x8x64xf32> to vector<4x8x64xbf16>
    %52 = vector.shape_cast %46 : vector<32x64xf32> to vector<4x8x64xf32>
    %53 = arith.truncf %52 : vector<4x8x64xf32> to vector<4x8x64xbf16>
    "tpu.trace_start"() <{level = 10 : i32, message = "hid,hdj->hij"}> : () -> ()
    %cst_18 = arith.constant dense<0.000000e+00> : vector<4x64x64xf32>
    %54 = tpu.matmul %49, %51, %cst_18 {dimension_numbers = #tpu.dot_dimension_numbers<[2], [1], [1], [2], [0, 0, 0, 1, 1, 2], [0], [0]>} : vector<4x64x8xbf16>, vector<4x8x64xbf16>, vector<4x64x64xf32> -> vector<4x64x64xf32>
    "tpu.trace_stop"() : () -> ()
    %cst_19 = arith.constant dense<0xFF800000> : vector<4x64xf32>
    %55 = vector.multi_reduction <maximumf>, %54, %cst_19 [2] : vector<4x64x64xf32> to vector<4x64xf32>
    %56 = vector.shape_cast %55 : vector<4x64xf32> to vector<4x64x1xf32>
    %57 = vector.broadcast %56 : vector<4x64x1xf32> to vector<4x64x64xf32>
    %58 = arith.subf %54, %57 : vector<4x64x64xf32>
    %59 = math.exp %58 : vector<4x64x64xf32>
    %cst_20 = arith.constant dense<0.000000e+00> : vector<4x64xf32>
    %60 = vector.multi_reduction <add>, %59, %cst_20 [2] : vector<4x64x64xf32> to vector<4x64xf32>
    %61 = vector.shape_cast %60 : vector<4x64xf32> to vector<4x64x1xf32>
    %62 = tpu.reciprocal %61 {approx = true} : vector<4x64x1xf32> -> vector<4x64x1xf32>
    %63 = vector.broadcast %62 : vector<4x64x1xf32> to vector<4x64x64xf32>
    %64 = arith.mulf %59, %63 : vector<4x64x64xf32>
    %65 = arith.truncf %64 : vector<4x64x64xf32> to vector<4x64x64xbf16>
    "tpu.trace_start"() <{level = 10 : i32, message = "hdj,hij->hdi"}> : () -> ()
    %cst_21 = arith.constant dense<0.000000e+00> : vector<4x8x64xf32>
    %66 = tpu.matmul %53, %65, %cst_21 {dimension_numbers = #tpu.dot_dimension_numbers<[2], [2], [1], [1], [0, 0, 0, 1, 1, 1], [0], [0]>} : vector<4x8x64xbf16>, vector<4x64x64xbf16>, vector<4x8x64xf32> -> vector<4x8x64xf32>
    "tpu.trace_stop"() : () -> ()
    %67 = vector.shape_cast %66 : vector<4x8x64xf32> to vector<32x64xf32>
    %cst_22 = arith.constant dense<0.000000e+00> : vector<32xf32>
    %68 = vector.multi_reduction <add>, %3, %cst_22 [1] : vector<32x64xf32> to vector<32xf32>
    %69 = vector.shape_cast %68 : vector<32xf32> to vector<32x1xf32>
    %cst_23 = arith.constant 6.400000e+01 : f32
    %70 = vector.broadcast %cst_23 : f32 to vector<32x1xf32>
    %71 = arith.divf %69, %70 : vector<32x1xf32>
    %72 = vector.broadcast %71 : vector<32x1xf32> to vector<32x64xf32>
    %73 = arith.mulf %1, %72 : vector<32x64xf32>
    %74 = tpu.concatenate %67, %73, %1 in 0 : vector<32x64xf32>, vector<32x64xf32>, vector<32x64xf32> -> vector<96x64xf32>
    %75 = arith.truncf %74 : vector<96x64xf32> to vector<96x64xbf16>
    %c0_24 = arith.constant 0 : index
    %c0_25 = arith.constant 0 : index
    %76 = vector.load %arg4[%c0_24, %c0_25] : memref<16x97xbf16, #tpu.memory_space<vmem>>, vector<16x96xbf16>
    %c0_26 = arith.constant 0 : index
    %c96 = arith.constant 96 : index
    %77 = vector.load %arg4[%c0_26, %c96] : memref<16x97xbf16, #tpu.memory_space<vmem>>, vector<16x1xbf16>
    %78 = arith.extf %77 : vector<16x1xbf16> to vector<16x1xf32>
    %cst_27 = arith.constant dense<0.000000e+00> : vector<16x64xf32>
    %79 = tpu.matmul %76, %75, %cst_27 {dimension_numbers = #tpu.dot_dimension_numbers<[1], [0], [0], [1], [0, 0, 1, 1], [], []>} : vector<16x96xbf16>, vector<96x64xbf16>, vector<16x64xf32> -> vector<16x64xf32>
    %80 = vector.broadcast %78 : vector<16x1xf32> to vector<16x64xf32>
    %81 = arith.addf %79, %80 : vector<16x64xf32>
    %c0_28 = arith.constant 0 : index
    %c0_29 = arith.constant 0 : index
    %c0_30 = arith.constant 0 : index
    %82 = vector.load %arg5[%c0_28, %c0_29, %c0_30] : memref<1x16x64xf32, #tpu.memory_space<vmem>>, vector<1x16x64xf32>
    %83 = vector.shape_cast %82 : vector<1x16x64xf32> to vector<16x64xf32>
    %84 = vector.shape_cast %81 : vector<16x64xf32> to vector<1x16x64xf32>
    tpu.vector_store %arg5[%c0_28, %c0_29, %c0_30], %84 {strides = array<i32>} : memref<1x16x64xf32, #tpu.memory_space<vmem>>, vector<1x16x64xf32>,
    return
  }
  func.func @transform_0(%arg0: i32) -> (i32, i32, i32) {
    %c0_i32 = arith.constant 0 : i32
    %c0_i32_0 = arith.constant 0 : i32
    %c0_i32_1 = arith.constant 0 : i32
    return %arg0, %c0_i32, %c0_i32_0 : i32, i32, i32
  }
  func.func @transform_1(%arg0: i32) -> (i32, i32, i32) {
    %c0_i32 = arith.constant 0 : i32
    %c0_i32_0 = arith.constant 0 : i32
    %c0_i32_1 = arith.constant 0 : i32
    return %arg0, %c0_i32, %c0_i32_0 : i32, i32, i32
  }
  func.func @transform_2(%arg0: i32) -> (i32, i32) {
    %c0_i32 = arith.constant 0 : i32
    %c0_i32_0 = arith.constant 0 : i32
    %c0_i32_1 = arith.constant 0 : i32
    return %c0_i32, %c0_i32_0 : i32, i32
  }
  func.func @transform_3(%arg0: i32) -> (i32, i32) {
    %c0_i32 = arith.constant 0 : i32
    %c0_i32_0 = arith.constant 0 : i32
    %c0_i32_1 = arith.constant 0 : i32
    return %c0_i32, %c0_i32_0 : i32, i32
  }
  func.func @transform_4(%arg0: i32) -> (i32, i32, i32) {
    %c0_i32 = arith.constant 0 : i32
    %c0_i32_0 = arith.constant 0 : i32
    %c0_i32_1 = arith.constant 0 : i32
    return %arg0, %c0_i32, %c0_i32_0 : i32, i32, i32
  }
}

</mosaic_0001>

<bundles_post_ra>
// kernel: tpu_custom_call.1
= control target key start
LH: loop header
LB: loop body
LE: loop exit
PB: predicated region body
PF: predicated region fallthrough
CT: control target
= control target key end

     0   :  { %9 = vsyncpa [#allocation3], 0  ;;  %s3279_s0 = inlined_call_operand.vmem [shape: f32[2,32,64], index: 0, kind: input, shape index: {}]   ;;  %s3280_s1 = inlined_call_operand.hbm [shape: f32[2,32,64], index: 1, kind: input, shape index: {}]   ;;  %s3281_s2 = inlined_call_operand.vmem [shape: bf16[96,65], index: 2, kind: input, shape index: {}]   ;;  %s3282_s3 = inlined_call_operand.vmem [shape: bf16[16,97], index: 3, kind: input, shape index: {}]   ;;  %s3283_s4 = inlined_call_operand.hbm [shape: f32[2,16,64], index: 4, kind: output, shape index: {}]  }
   0x1   :  { %11 = vsyncpa [#allocation3 + $0x1], 0 }
   0x2   :  { %12 = vsyncpa [#allocation4], 0 }
   0x3   :  { %14 = vsyncpa [#allocation4 + $0x1], 0  ;;  %s2524_s15 = smov 0   ;;  %s2526_s16 = smov 0  }
   0x4   :  { %s2528_s17 = smov 0   ;;  %s2530_s18 = smov 0  }
   0x5 LB: > { %s2545_s19 = sadd.s32 4294967295, %s2487_s18   ;;  %s1805_s20 = sadd.s32 4294967294, %s2487_s18   ;;  %s2487_s18 = sphi %s2530_s18, %s3296_s18   ;;  %s2483_s17 = sphi %s2528_s17, %s3295_s17   ;;  %s2479_s16 = sphi %s2526_s16, %s3294_s16   ;;  %s2475_s15 = sphi %s2524_s15, %s3293_s15  }
   0x6   : > { %s2549_s21 = sadd.s32 1, %s2487_s18   ;;  %s53_s22 = sadd.s32 1, %s2483_s17 }
   0x7   : > { %s50_s23 = ssub.s32 %s2487_s18, %s2549_s21  ;;  %p60_p0 = scmp.ne.s32.totalorder %s2483_s17, %s2479_s16 }
   0x8   : > { %p51_p1 = scmp.eq.s32.totalorder %s50_s23, 0  ;;  %p61_p2 = scmp.eq.s32.totalorder %s2487_s18, 0 }
   0x9   : > { %p66_p3 = scmp.ne.s32.totalorder %s2479_s16, %s2475_s15  ;;  %p67_p4 = scmp.eq.s32.totalorder %s2545_s19, 0 }
   0xa   : > { %s2561_s24 = scalar_select %p51_p1, %s2483_s17, %s53_s22  }
   0xb   : > { %p2563_p5 = por %p61_p2, %p60_p0  ;;  %p2567_p6 = por %p67_p4, %p66_p3 }
   0xc   : > { %p132_p7 = scmp.eq.s32.totalorder %s2545_s19, 1  ;;  %p138_p8 = scmp.eq.s32.totalorder %s1805_s20, 1 }
   0xd   : > { %p2058_p10 = scmp.lt.s32.totalorder %s2487_s18, 2  ;;  %s172_s29 = sand.u32 1, %s2483_s17  }
   0xe   : > { %p2574_p11 = por %p132_p7, %p60_p0  ;;  %p2578_p12 = por %p138_p8, %p66_p3 }
   0xf   : > { %s1855_s30 = sshll.u32 %s2487_s18, 9  ;;  %s1808_s5 = sshll.u32 %s172_s29, 5 }
  0x10   : > { %s3287_s27 = scalar_select %p2574_p11, 1, 0 }
  0x11   : > { %s3288_s28 = scalar_select %p2578_p12, 1, 0 }
  0x12   : > { %s2587_s8 = scalar_lea.hbm %s3280_s1, %s1855_s30  ;;  %s176_s9 = scalar_lea.vmem [#allocation2], %s1808_s5 }
  0x13   : > { %s183_s10 = sshll.u32 %s176_s9, 4  ;;  %p2591_p13 = pnand %p2058_p10, %p2563_p5  ;;  %s2595_s10 = int_to_ptr.vmem [resolvable:$true] %s183_s10 }
  0x14   : > { %s2597_s12 = scalar_lea.sflag [#allocation3], %s172_s29  ;;  %s2391_s13 = scalar_lea.hbm %s2587_s8, 512 }
  0x15   : > { %p2392_p0 = scmp.ne.s32.totalorder %s2587_s8, %s2391_s13  ;;  %p2393_p1 = pneg %p2591_p13 }
  0x16   : > { %s2396_s22 = scalar_lea.hbm %s3280_s1, 1024  ;;  %p2397_p4 = scmp.lt.u32.totalorder %s2587_s8, %s3280_s1 }
  0x17   : > { %p2394_p2 = pnand %p2393_p1, %p2392_p0  ;;  %p2398_p5 = scmp.lt.u32.totalorder %s2396_s22, %s2391_s13 }
  0x18   : > { %p2400_p8 = scmp.lt.u32.totalorder %s2391_s13, %s2587_s8 }
  0x19   : > { %p2395_p3 = pneg %p2394_p2  ;;  %p2399_p7 = por %p2398_p5, %p2397_p4 }
  0x1b   : > { %p2401_p10 = por %p2400_p8, %p2399_p7 }
  0x1d   : > { %p2402_p9 = pnand %p2401_p10, %p2395_p3 }
  0x1f   : > { %2405 = shalt.err (!%p2402_p9)
}
  0x20   : > { %s2406_s29 = scalar_lea.vmem %s2595_s10, 512  ;;  %s2489_s30 = smov [#allocation2]  }
  0x21   : > { %p2407_p0 = scmp.ne.s32.totalorder %s2595_s10, %s2406_s29  ;;  %s2411_s5 = sshll.u32 %s2489_s30, 4  ;;  %s2412_s5 = int_to_ptr.vmem [resolvable:$false] %s2411_s5 }
  0x22   : > { %s2413_s6 = scalar_lea.vmem %s2412_s5, 1024  ;;  %p2414_p11 = scmp.lt.s32.totalorder %s2595_s10, %s2412_s5 }
  0x23   : > { %p2409_p2 = pnand %p2407_p0, %p2393_p1  ;;  %p2415_p4 = scmp.lt.s32.totalorder %s2413_s6, %s2406_s29 }
  0x25   : > { %p2410_p12 = pneg %p2409_p2  ;;  %p2416_p5 = por %p2415_p4, %p2414_p11 }
  0x27   : > { %p2417_p7 = pnand %p2416_p5, %p2410_p12 }
  0x29   : > { %2420 = shalt.err (!%p2417_p7)
}
  0x2a   : > { %s2490_s7 = smov 128   ;;  %s2491_s9 = smov 8  }
  0x2b   : > { %2053 = dma.hbm_to_vmem [thread:$0]  (!%p2591_p13), %s2587_s8, 512, %s2595_s10, %s2597_s12, %s2490_s7, %s2490_s7, %s2491_s9  }
  0x2c   : > { %p1811_p9 = scmp.ge.s32.totalorder %s2487_s18, 1  ;;  %p191_p1 = scmp.lt.s32.totalorder %s2487_s18, 3 }
  0x2e   : > { %p192_p3 = pnand %p1811_p9, %p191_p1 }
  0x2f   : > { %s2628_s13 = sand.u32 (!%p192_p3), 1, %s2479_s16  }
  0x30   : > { %195 = sbr.rel (%p192_p3) target bundleno = 1892 (0x764), region = 36  ;;  %s1812_s14 = sshll.u32 (!%p192_p3), %s2628_s13, 5 }
  0x31   : > { %s198_s20 = scalar_lea.sflag (!%p192_p3), [#allocation3], %s2628_s13  ;;  %s201_s22 = scalar_lea.vmem (!%p192_p3), [#allocation2], %s1812_s14 }
  0x37   : > { %2466 = dma.done.wait (%p2567_p6), %s198_s20, 512  }
  0x38   : > { %2468 = vsyncadd (%p2567_p6), %s198_s20, 4294966784  ;;  %p231_p11 = scmp.lt.s32.totalorder %s2545_s19, 1  ;;  %vm245_vm0 = vcmask 523264   ;;  %v241_v8 = vld [vmem:[%s201_s22] sm:$0xff]  ;;  %v242_v9 = vld [vmem:[%s201_s22 + $0x8] sm:$0xff]  ;;  %vm733_vm1 = vcmask 1043456  }
  0x39   : > { %v299_v10 = vsel %vm245_vm0, %v241_v8, 0.0  ;;  %v302_v11 = vsel %vm245_vm0, %v242_v9, 0.0  ;;  %v243_v12 = vld [vmem:[%s201_s22 + $0x10] sm:$0xff]  ;;  %v244_v13 = vld [vmem:[%s201_s22 + $0x18] sm:$0xff]  ;;  %v355_v62 = vld [vmem:[%s3281_s2] sm:$0xff]   ;;  %vm720_vm2 = vcmask 64512  }
  0x3a   : > { %s232_s8 = scalar_select %p231_p11, %s2545_s19, 1  ;;  %v305_v14 = vsel %vm245_vm0, %v243_v12, 0.0  ;;  %v308_v15 = vsel %vm245_vm0, %v244_v13, 0.0  ;;  %1923 = vmatprep.mubr.msk.bf16.mxu0 %vm245_vm0, %v355_v62  ;;  %v367_v63 = vunpack.c.l.bf16 %v355_v62  ;;  %vm2494_vm3 = vmmov 0  }
  0x3b   : > { %vm1659_vm4 = vcmask 785408   ;;  %s1813_s12 = sshll.u32 %s2628_s13, 4  ;;  %s1857_s29 = sshll.u32 %s2545_s19, 8 }
  0x3c   : > { %s1856_s10 = sshll.u32 %s232_s8, 5  ;;  %s230_s26 = scalar_lea.vmem [#allocation5], %s1813_s12 }
  0x3d   : > { %s2641_s23 = scalar_lea.vmem %s3279_s0, %s1856_s10  ;;  %s1720_s25 = sshll.u32 %s230_s26, 4  ;;  %s3228_s25 = int_to_ptr.vmem [resolvable:$true] %s1720_s25 }
  0x3e   : > { %v237_v0 = vld [vmem:[%s2641_s23] sm:$0xff]  ;;  %v239_v1 = vld [vmem:[%s2641_s23 + $0x10] sm:$0xff]  ;;  %v238_v2 = vld [vmem:[%s2641_s23 + $0x8] sm:$0xff]  ;;  %s3233_s5 = scalar_lea.hbm %s3283_s4, %s1857_s29  ;;  %s1707_s19 = scalar_lea.sflag [#allocation4], %s2628_s13 }
  0x3f   : > { %v246_v3 = vsel %vm245_vm0, %v237_v0, 0.0  ;;  %v252_v4 = vsel %vm245_vm0, %v239_v1, 0.0  ;;  %v240_v5 = vld [vmem:[%s2641_s23 + $0x18] sm:$0xff]  ;;  %v249_v6 = vsel %vm245_vm0, %v238_v2, 0.0  ;;  %s2421_s6 = scalar_lea.vmem %s3228_s25, 256  ;;  %p3290_p12 = scmp.ne.s32.totalorder %s3287_s27, 0 }
  0x40   : > { %247 = vadd.xlane.f32.xlu0 %v246_v3  ;;  %253 = vadd.xlane.f32.xlu1 %v252_v4  ;;  %v255_v7 = vsel %vm245_vm0, %v240_v5, 0.0  ;;  %p2422_p6 = scmp.ne.s32.totalorder %s3228_s25, %s2421_s6  ;;  %s2496_s7 = smov [#allocation5]  }
  0x41   : > { %s2425_s9 = sshll.u32 %s2496_s7, 4  ;;  %s2426_s9 = int_to_ptr.vmem [resolvable:$false] %s2425_s9 }
  0x42   : > { %p2423_p13 = pnand %p2422_p6, %p3290_p12  ;;  %s2427_s14 = scalar_lea.vmem %s2426_s9, 512 }
  0x43   : > { %p2428_p10 = scmp.lt.s32.totalorder %s3228_s25, %s2426_s9  ;;  %p2429_p0 = scmp.lt.s32.totalorder %s2427_s14, %s2421_s6 }
  0x44   : > { %250 = vadd.xlane.f32.xlu0 %v249_v6  ;;  %256 = vadd.xlane.f32.xlu1 %v255_v7  ;;  %v2727_v6 = vld [vmem:[%s3281_s2 + $0x18] sm:$0xff]   ;;  %v2492_v7 = vmov 64   ;;  %p2424_p8 = pneg %p2423_p13 }
  0x45   : > { %2101 = vset.pattern.permute.xlu1 %v2492_v7  ;;  %2100 = vset.pattern.permute.xlu0 %v2492_v7  ;;  %p2430_p2 = por %p2429_p0, %p2428_p10 }
  0x47   : > { %p2431_p4 = pnand %p2430_p2, %p2424_p8 }
  0x48   : > { %300 = vadd.xlane.f32.xlu0 %v299_v10  ;;  %303 = vadd.xlane.f32.xlu1 %v302_v11 }
  0x4c   : > { %306 = vadd.xlane.f32.xlu0 %v305_v14  ;;  %309 = vadd.xlane.f32.xlu1 %v308_v15 }
  0xcd   : > { %v248_v16 = vpop.xlane.xlu0 %247  ;;  %v254_v17 = vpop.xlane.xlu1 %253 }
  0xce   : > { %v259_v18 = vmul.f32 0.015625, %v248_v16  ;;  %v261_v19 = vmul.f32 0.015625, %v254_v17 }
  0xd0   : > { %v2655_v20 = vsub.f32 %v237_v0, %v259_v18  ;;  %v2657_v21 = vsub.f32 %v239_v1, %v261_v19 }
  0xd1   : > { %v251_v22 = vpop.xlane.xlu0 %250  ;;  %v257_v23 = vpop.xlane.xlu1 %256 }
  0xd2   : > { %v260_v24 = vmul.f32 0.015625, %v251_v22  ;;  %v262_v25 = vmul.f32 0.015625, %v257_v23  ;;  %v267_v26 = vmul.f32 %v2655_v20, %v2655_v20  ;;  %v269_v27 = vmul.f32 %v2657_v21, %v2657_v21 }
  0xd4   : > { %v2663_v28 = vsub.f32 %v238_v2, %v260_v24  ;;  %v2665_v29 = vsub.f32 %v240_v5, %v262_v25  ;;  %v271_v30 = vsel %vm245_vm0, %v267_v26, 0.0  ;;  %v277_v35 = vsel %vm245_vm0, %v269_v27, 0.0 }
  0xd5   : > { %272 = vadd.xlane.f32.xlu0 %v271_v30  ;;  %v301_v31 = vpop.xlane.xlu0 %300  ;;  %v304_v32 = vpop.xlane.xlu1 %303 }
  0xd6   : > { %v311_v33 = vmul.f32 0.015625, %v301_v31  ;;  %v312_v34 = vmul.f32 0.015625, %v304_v32  ;;  %v268_v36 = vmul.f32 %v2663_v28, %v2663_v28  ;;  %v270_v37 = vmul.f32 %v2665_v29, %v2665_v29 }
  0xd8   : > { %v2673_v38 = vsub.f32 %v241_v8, %v311_v33  ;;  %v2675_v39 = vmul.f32 %v311_v33, %v237_v0  ;;  %v2677_v40 = vsub.f32 %v242_v9, %v312_v34  ;;  %v2679_v41 = vmul.f32 %v312_v34, %v238_v2  ;;  %v2719_v2 = vld [vmem:[%s3281_s2 + $0x10] sm:$0xff]  }
  0xd9   : > { %278 = vadd.xlane.f32.xlu0 %v277_v35  ;;  %v274_v42 = vsel %vm245_vm0, %v268_v36, 0.0  ;;  %v307_v43 = vpop.xlane.xlu0 %306  ;;  %v310_v44 = vpop.xlane.xlu1 %309  ;;  %v280_v49 = vsel %vm245_vm0, %v270_v37, 0.0  ;;  %v368_v0 = vunpack.c.h.bf16 %v355_v62  ;;  %v371_v3 = vunpack.c.l.bf16 %v2719_v2 }
  0xda   : > { %v1636_v45 = vpack.c.bf16 %v2679_v41, %v2675_v39  ;;  %275 = vadd.xlane.f32.xlu1 %v274_v42  ;;  %v313_v46 = vmul.f32 0.015625, %v307_v43  ;;  %v314_v47 = vmul.f32 0.015625, %v310_v44  ;;  %v319_v48 = vmul.f32 %v2673_v38, %v2673_v38 }
  0xdb   : > { %v320_v50 = vmul.f32 %v2677_v40, %v2677_v40  ;;  %v2102_v8 = vpack.i.bf16 %v371_v3, %v368_v0  ;;  %v374_v9 = vunpack.c.h.bf16 %v2727_v6  ;;  %v372_v11 = vunpack.c.h.bf16 %v2719_v2 }
  0xdc   : > { %v2689_v51 = vsub.f32 %v243_v12, %v313_v46  ;;  %v2691_v52 = vmul.f32 %v313_v46, %v239_v1  ;;  %v2693_v53 = vsub.f32 %v244_v13, %v314_v47  ;;  %v2695_v54 = vmul.f32 %v314_v47, %v240_v5  ;;  %v2714_v1 = vld [vmem:[%s3281_s2 + $0x8] sm:$0xff]  }
  0xdd   : > { %v323_v55 = vsel %vm245_vm0, %v319_v48, 0.0  ;;  %v326_v58 = vsel %vm245_vm0, %v320_v50, 0.0  ;;  %v369_v4 = vunpack.c.l.bf16 %v2714_v1  ;;  %v370_v5 = vunpack.c.h.bf16 %v2714_v1 }
  0xde   : > { %v1637_v56 = vpack.c.bf16 %v2695_v54, %v2691_v52  ;;  %281 = vadd.xlane.f32.xlu1 %v280_v49  ;;  %324 = vadd.xlane.f32.xlu0 %v323_v55  ;;  %v321_v57 = vmul.f32 %v2689_v51, %v2689_v51  ;;  %v322_v59 = vmul.f32 %v2693_v53, %v2693_v53  ;;  %v373_v12 = vunpack.c.l.bf16 %v2727_v6 }
  0xdf   : > { %v2107_v10 = vpack.i.bf16 %v370_v5, %v369_v4 }
  0xe0   : > { %v329_v60 = vsel %vm245_vm0, %v321_v57, 0.0  ;;  %v332_v61 = vsel %vm245_vm0, %v322_v59, 0.0  ;;  %v2112_v13 = vpack.i.bf16 %v373_v12, %v372_v11 }
  0xe2   : > { %327 = vadd.xlane.f32.xlu1 %v326_v58  ;;  %330 = vadd.xlane.f32.xlu0 %v329_v60 }
  0xe6   : > { %333 = vadd.xlane.f32.xlu1 %v332_v61 }
  0xf7   : > { %2103 = vperm.xlu1 %2101, %v2102_v8  }
  0xf8   : > { %381 = vperm.xlu0 %2100, %v367_v63  }
  0xfb   : > { %2108 = vperm.xlu1 %2101, %v2107_v10  }
  0xfc   : > { %416 = vperm.xlu0 %2100, %v374_v9  }
  0xff   : > { %2113 = vperm.xlu1 %2101, %v2112_v13  }
 0x162   : > { %v273_v14 = vpop.xlane.xlu0 %272 }
 0x163   : > { %v283_v15 = vmul.f32 0.015625, %v273_v14 }
 0x165   : > { %v287_v16 = vadd.f32 1e-06, %v283_v15 }
 0x166   : > { %v279_v17 = vpop.xlane.xlu0 %278 }
 0x167   : > { %v276_v18 = vpop.xlane.xlu1 %275  ;;  %v285_v19 = vmul.f32 0.015625, %v279_v17  ;;  %2231 = vrsqrt.f32 %v287_v16 }
 0x168   : > { %v284_v22 = vmul.f32 0.015625, %v276_v18 }
 0x169   : > { %v289_v24 = vadd.f32 1e-06, %v285_v19 }
 0x16a   : > { %v288_v23 = vadd.f32 1e-06, %v284_v22 }
 0x16b   : > { %v282_v25 = vpop.xlane.xlu1 %281  ;;  %v325_v26 = vpop.xlane.xlu0 %324 }
 0x16c   : > { %2233 = vrsqrt.f32 %v288_v23  ;;  %v286_v27 = vmul.f32 0.015625, %v282_v25  ;;  %v335_v30 = vmul.f32 0.015625, %v325_v26  ;;  %v2754_v26 = vld [vmem:[%s3281_s2 + $0x20] sm:$0xff]  }
 0x16d   : > { %2235 = vrsqrt.f32 %v289_v24 }
 0x16e   : > { %v290_v31 = vadd.f32 1e-06, %v286_v27  ;;  %v339_v32 = vadd.f32 1e-06, %v335_v30  ;;  %v2759_v27 = vld [vmem:[%s3281_s2 + $0x28] sm:$0xff]  }
 0x16f   : > { %v328_v33 = vpop.xlane.xlu1 %327  ;;  %v331_v34 = vpop.xlane.xlu0 %330 }
 0x170   : > { %2237 = vrsqrt.f32 %v290_v31  ;;  %v336_v35 = vmul.f32 0.015625, %v328_v33  ;;  %v337_v36 = vmul.f32 0.015625, %v331_v34 }
 0x171   : > { %2239 = vrsqrt.f32 %v339_v32  ;;  %v2232_v44 = vpop.eup %2231 }
 0x172   : > { %v340_v37 = vadd.f32 1e-06, %v336_v35  ;;  %v341_v42 = vadd.f32 1e-06, %v337_v36  ;;  %v295_v49 = vmul.f32 %v2232_v44, %v2655_v20 }
 0x173   : > { %v334_v43 = vpop.xlane.xlu1 %333 }
 0x174   : > { %2241 = vrsqrt.f32 %v340_v37  ;;  %v338_v46 = vmul.f32 0.015625, %v334_v43 }
 0x175   : > { %2243 = vrsqrt.f32 %v341_v42 }
 0x176   : > { %v2234_v47 = vpop.eup %2233  ;;  %v342_v48 = vadd.f32 1e-06, %v338_v46 }
 0x177   : > { %v296_v50 = vmul.f32 %v2234_v47, %v2663_v28  ;;  %v2236_v55 = vpop.eup %2235  ;;  %v382_v9 = vpop.permute.xlu0 %381 }
 0x178   : > { %2245 = vrsqrt.f32 %v342_v48  ;;  %v297_v59 = vmul.f32 %v2236_v55, %v2657_v21 }
 0x179   : > { %v351_v57 = vpack.c.bf16 %v296_v50, %v295_v49 }
 0x17a   : > { %v2238_v58 = vpop.eup %2237 }
 0x17b   : > { %1915 = vmatprep.subr.bf16.mxu0 %v351_v57  ;;  %v298_v60 = vmul.f32 %v2238_v58, %v2665_v29  ;;  %v2240_v61 = vpop.eup %2239  ;;  %v417_v16 = vpop.permute.xlu0 %416 }
 0x17c   : > { %1916 = vmatpush3.bf16.msra.mxu0 %v351_v57  ;;  %v347_v0 = vmul.f32 %v2240_v61, %v2673_v38  ;;  %v2104_v38 = vpop.permute.xlu1 %2103 }
 0x17d   : > { %v352_v62 = vpack.c.bf16 %v298_v60, %v297_v59 }
 0x17e   : > { %v2242_v63 = vpop.eup %2241 }
 0x17f   : > { %1917 = vmatprep.subr.bf16.mxu0 %v352_v62  ;;  %v348_v20 = vmul.f32 %v2242_v63, %v2677_v40  ;;  %v2244_v3 = vpop.eup %2243 }
 0x180   : > { %1918 = vmatpush3.bf16.msra.mxu0 %v352_v62  ;;  %v349_v5 = vmul.f32 %v2244_v3, %v2689_v51  ;;  %v2109_v40 = vpop.permute.xlu1 %2108 }
 0x181   : > { %v353_v28 = vpack.c.bf16 %v348_v20, %v347_v0 }
 0x182   : > { %v2246_v4 = vpop.eup %2245 }
 0x183   : > { %1919 = vmatprep.subr.bf16.mxu0 %v353_v28  ;;  %v350_v21 = vmul.f32 %v2246_v4, %v2693_v53 }
 0x184   : > { %1920 = vmatpush3.bf16.msra.mxu0 %v353_v28 }
 0x185   : > { %v354_v29 = vpack.c.bf16 %v350_v21, %v349_v5 }
 0x187   : > { %1921 = vmatprep.subr.bf16.mxu0 %v354_v29 }
 0x188   : > { %1922 = vmatpush3.bf16.msra.mxu0 %v354_v29 }
 0x18b   : > { %1924 = vmatmul.mubr.msk.bf16.vlgmr.msra.gmra.mrb[0].mxu0 %vm245_vm0, %v2714_v1  ;;  %v2746_v1 = vpop.permute.xlu1 %2113 }
 0x18c   : > { %1927 = vmatprep.mubr.msk.bf16.mxu0 %vm245_vm0, %v2719_v2 }
 0x193   : > { %1928 = vmatmul.mubr.msk.bf16.gmra.mrb[4].mxu0 %vm245_vm0, %v2727_v6 }
 0x194   : > { %1931 = vmatprep.mubr.msk.bf16.mxu0 %vm245_vm0, %v2754_v26 }
 0x19b   : > { %1932 = vmatmul.mubr.msk.bf16.gmra.mrb[8].mxu0 %vm245_vm0, %v2759_v27 }
 0x25e   : > { %v1925_v7 = vpop.f32.mrb[0].mxu0 }
 0x25f   : > { %v521_v8 = vpop.f32.mrb[1].mxu0  ;;  %v2379_v53 = vadd.low.f32.bf16 %v1925_v7, %v2109_v40 }
 0x260   : > { %v1926_v51 = vpop.f32.mrb[2].mxu0  ;;  %v522_v12 = vadd.f32 %v521_v8, %v382_v9 }
 0x261   : > { %v2380_v10 = vadd.high.f32.bf16 %v1926_v51, %v2109_v40  ;;  %v524_v11 = vpop.f32.mrb[3].mxu0 }
 0x262   : > { %v2381_v13 = vadd.low.f32.bf16 %v524_v11, %v2104_v38 }
 0x263   : > { %v2159_v14 = vpack.i.bf16 %v2380_v10, %v2379_v53 }
 0x264   : > { %v2117_v15 = vpack.i.bf16 %v2381_v13, %v522_v12 }
 0x265   : > { %2160 = vxpose.xlu0.b32.start.end [1/1] (short) (narrow) %v2159_v14, 64 }
 0x266   : > { %v2748_v2 = vpop.f32.mrb[4].mxu0  ;;  %2118 = vxpose.xlu1.b32.start.end [1/1] (short) (narrow) %v2117_v15, 64 }
 0x267   : > { %v537_v6 = vpop.f32.mrb[5].mxu0  ;;  %v2384_v51 = vadd.high.f32.bf16 %v2748_v2, %v2746_v1 }
 0x268   : > { %v2382_v17 = vadd.high.f32.bf16 %v537_v6, %v2104_v38  ;;  %v1930_v18 = vpop.f32.mrb[6].mxu0 }
 0x269   : > { %v549_v19 = vadd.f32 %v1930_v18, %v417_v16  ;;  %v540_v22 = vpop.f32.mrb[7].mxu0 }
 0x26a   : > { %v712_v23 = vpack.c.bf16 %v2382_v17, %v2382_v17  ;;  %v2383_v24 = vadd.low.f32.bf16 %v540_v22, %v2746_v1  ;;  %v714_v17 = vpack.c.bf16 %v2384_v51, %v2384_v51 }
 0x26b   : > { %v715_v25 = vpack.c.bf16 %v549_v19, %v549_v19 }
 0x26c   : > { %v2761_v30 = vpack.c.bf16 %v2383_v24, %v2383_v24  ;;  %2041 = vmatprep.subr.msk.bf16.mxu0 %vm733_vm1, %v712_v23  ;;  %2042 = vmatprep.subr.msk.bf16.mxu1 %vm733_vm1, %v712_v23  ;;  %v735_v31 = vsel %vm733_vm1, %v712_v23, 0 }
 0x26d   : > { %1936 = vmatpush3.bf16.msra.mxu0 %v735_v31  ;;  %2040 = vmatpush3.bf16.msra.mxu1 %v735_v31  ;;  %v975_v63 = vsel %vm733_vm1, %v715_v25, 0 }
 0x26e   : > { %2043 = vmatprep.subr.msk.bf16.mxu1 %vm733_vm1, %v2761_v30  ;;  %2045 = vmatprep.subr.msk.bf16.mxu0 %vm733_vm1, %v715_v25  ;;  %v815_v18 = vsel %vm733_vm1, %v2761_v30, 0  ;;  %v895_v25 = vsel %vm733_vm1, %v714_v17, 0 }
 0x2e5   : > { %v2773_v32 = vpop.trf.xlu0 }
 0x2e6   : > { %v2119_v33 = vpop.trf.xlu1  ;;  %v2165_v46 = vunpack.i.h.bf16 %v2773_v32  ;;  %v2162_v30 = vunpack.i.l.bf16 %v2773_v32 }
 0x2e7   : > { %v2120_v36 = vunpack.i.l.bf16 %v2119_v33  ;;  %v2123_v14 = vunpack.i.h.bf16 %v2119_v33 }
 0x2e9   : > { %v2775_v34 = vpop.trf.xlu0 }
 0x2ea   : > { %v2124_v35 = vpop.trf.xlu1  ;;  %v2170_v47 = vunpack.i.h.bf16 %v2775_v34  ;;  %v2167_v31 = vunpack.i.l.bf16 %v2775_v34 }
 0x2eb   : > { %v2125_v37 = vunpack.i.l.bf16 %v2124_v35  ;;  %v2128_v53 = vunpack.i.h.bf16 %v2124_v35 }
 0x2ec   : > { %v708_v57 = vpack.c.bf16 %v2170_v47, %v2165_v46 }
 0x2ed   : > { %v696_v42 = vpack.c.bf16 %v2125_v37, %v2120_v36  ;;  %v2777_v43 = vpop.trf.xlu0  ;;  %v700_v16 = vpack.c.bf16 %v2128_v53, %v2123_v14  ;;  %v704_v36 = vpack.c.bf16 %v2167_v31, %v2162_v30 }
 0x2ee   : > { %v2129_v44 = vpop.trf.xlu1  ;;  %v2175_v61 = vunpack.i.h.bf16 %v2777_v43 }
 0x2ef   : > { %1937 = vmatprep.mubr.msk.bf16.mxu0 %vm720_vm2, %v696_v42  ;;  %v2130_v50 = vunpack.i.l.bf16 %v2129_v44  ;;  %v2133_v19 = vunpack.i.h.bf16 %v2129_v44  ;;  %v2172_v42 = vunpack.i.l.bf16 %v2777_v43  ;;  %v2816_v43 = vpop.f32.mrb[8].mxu0 }
 0x2f1   : > { %v2782_v48 = vpop.trf.xlu0 }
 0x2f2   : > { %v2134_v49 = vpop.trf.xlu1  ;;  %v2180_v62 = vunpack.i.h.bf16 %v2782_v48  ;;  %v2177_v44 = vunpack.i.l.bf16 %v2782_v48 }
 0x2f3   : > { %v2135_v55 = vunpack.i.l.bf16 %v2134_v49  ;;  %v2138_v1 = vunpack.i.h.bf16 %v2134_v49 }
 0x2f4   : > { %v709_v28 = vpack.c.bf16 %v2180_v62, %v2175_v61  ;;  %v705_v47 = vpack.c.bf16 %v2177_v44, %v2172_v42 }
 0x2f5   : > { %v697_v58 = vpack.c.bf16 %v2135_v55, %v2130_v50  ;;  %v2784_v59 = vpop.trf.xlu0  ;;  %v701_v23 = vpack.c.bf16 %v2138_v1, %v2133_v19 }
 0x2f6   : > { %v2139_v60 = vpop.trf.xlu1  ;;  %v2185_v0 = vunpack.i.h.bf16 %v2784_v59  ;;  %v2182_v46 = vunpack.i.l.bf16 %v2784_v59 }
 0x2f7   : > { %1938 = vmatmul.mubr.msk.bf16.vlgmr.msra.gmra.mrb[12].mxu0 %vm720_vm2, %v697_v58  ;;  %v2140_v21 = vunpack.i.l.bf16 %v2139_v60  ;;  %v2143_v22 = vunpack.i.h.bf16 %v2139_v60 }
 0x2f8   : > { %1966 = vmatpush3.bf16.msra.mxu0 %v975_v63  ;;  %1967 = vmatprep.mubr.msk.bf16.mxu0 %vm720_vm2, %v708_v57  ;;  %v2818_v57 = vpop.f32.mrb[9].mxu0 }
 0x2f9   : > { %v2186_v20 = vpop.trf.xlu0  ;;  %v2820_v48 = vpop.f32.mrb[10].mxu0 }
 0x2fa   : > { %v2144_v3 = vpop.trf.xlu1  ;;  %v2190_v4 = vunpack.i.h.bf16 %v2186_v20  ;;  %v2187_v32 = vunpack.i.l.bf16 %v2186_v20  ;;  %v2822_v58 = vpop.f32.mrb[11].mxu0 }
 0x2fb   : > { %v2145_v5 = vunpack.i.l.bf16 %v2144_v3  ;;  %v2148_v2 = vunpack.i.h.bf16 %v2144_v3 }
 0x2fc   : > { %v710_v29 = vpack.c.bf16 %v2190_v4, %v2185_v0  ;;  %v706_v49 = vpack.c.bf16 %v2187_v32, %v2182_v46 }
 0x2fd   : > { %v698_v38 = vpack.c.bf16 %v2145_v5, %v2140_v21  ;;  %v2191_v40 = vpop.trf.xlu0  ;;  %v702_v24 = vpack.c.bf16 %v2148_v2, %v2143_v22 }
 0x2fe   : > { %v2149_v7 = vpop.trf.xlu1  ;;  %v2195_v8 = vunpack.i.h.bf16 %v2191_v40  ;;  %v2192_v34 = vunpack.i.l.bf16 %v2191_v40 }
 0x2ff   : > { %1941 = vmatprep.mubr.msk.bf16.mxu1 %vm720_vm2, %v698_v38  ;;  %1968 = vmatmul.mubr.msk.bf16.vlgmr.msra.gmra.mrb[16].mxu0 %vm720_vm2, %v709_v28  ;;  %v2150_v12 = vunpack.i.l.bf16 %v2149_v7  ;;  %v2153_v35 = vunpack.i.h.bf16 %v2149_v7 }
 0x300   : > { %1971 = vmatprep.mubr.msk.bf16.mxu0 %vm720_vm2, %v710_v29 }
 0x301   : > { %v2196_v9 = vpop.trf.xlu0 }
 0x302   : > { %v2154_v10 = vpop.trf.xlu1  ;;  %v2200_v11 = vunpack.i.h.bf16 %v2196_v9  ;;  %v2197_v50 = vunpack.i.l.bf16 %v2196_v9 }
 0x303   : > { %v2155_v13 = vunpack.i.l.bf16 %v2154_v10  ;;  %v2158_v33 = vunpack.i.h.bf16 %v2154_v10 }
 0x304   : > { %v711_v15 = vpack.c.bf16 %v2200_v11, %v2195_v8  ;;  %v707_v55 = vpack.c.bf16 %v2197_v50, %v2192_v34 }
 0x305   : > { %v699_v6 = vpack.c.bf16 %v2155_v13, %v2150_v12  ;;  %v703_v37 = vpack.c.bf16 %v2158_v33, %v2153_v35 }
 0x307   : > { %1942 = vmatmul.mubr.msk.bf16.vlgmr.msra.gmra.mrb[0].mxu1 %vm720_vm2, %v699_v6  ;;  %1972 = vmatmul.mubr.msk.bf16.gmra.mrb[20].mxu0 %vm720_vm2, %v711_v15 }
 0x308   : > { %1946 = vmatpush3.bf16.msra.mxu1 %v815_v18  ;;  %1947 = vmatprep.mubr.msk.bf16.mxu1 %vm720_vm2, %v700_v16 }
 0x309   : > { %2044 = vmatprep.subr.msk.bf16.mxu1 %vm733_vm1, %v714_v17 }
 0x30f   : > { %1948 = vmatmul.mubr.msk.bf16.vlgmr.msra.gmra.mrb[4].mxu1 %vm720_vm2, %v701_v23 }
 0x310   : > { %1956 = vmatpush3.bf16.msra.mxu1 %v895_v25  ;;  %1951 = vmatprep.mubr.msk.bf16.mxu1 %vm720_vm2, %v702_v24 }
 0x317   : > { %1952 = vmatmul.mubr.msk.bf16.gmra.mrb[8].mxu1 %vm720_vm2, %v703_v37 }
 0x318   : > { %1957 = vmatprep.mubr.msk.bf16.mxu1 %vm720_vm2, %v704_v36 }
 0x31f   : > { %1958 = vmatmul.mubr.msk.bf16.vlgmr.msra.gmra.mrb[12].mxu1 %vm720_vm2, %v705_v47 }
 0x320   : > { %1961 = vmatprep.mubr.msk.bf16.mxu1 %vm720_vm2, %v706_v49 }
 0x327   : > { %1962 = vmatmul.mubr.msk.bf16.gmra.mrb[16].mxu1 %vm720_vm2, %v707_v55 }
 0x3ca   : > { %v2824_v59 = vpop.f32.mrb[12].mxu0 }
 0x3cb   : > { %v2826_v60 = vpop.f32.mrb[13].mxu0  ;;  %v1048_v20 = vsel %vm245_vm0, %v2824_v59, -inf }
 0x3cc   : > { %v2828_v61 = vpop.f32.mrb[14].mxu0  ;;  %v1042_v62 = vsel %vm245_vm0, %v2826_v60, -inf }
 0x3cd   : > { %1043 = vmax.xlane.f32.xlu1 %v1042_v62  ;;  %v2832_v63 = vpop.f32.mrb[15].mxu0  ;;  %v1051_v4 = vsel %vm245_vm0, %v2828_v61, -inf }
 0x3ce   : > { %v1045_v0 = vsel %vm245_vm0, %v2832_v63, -inf }
 0x3cf   : > { %1046 = vmax.xlane.f32.xlu0 %v1045_v0 }
 0x3d1   : > { %1049 = vmax.xlane.f32.xlu1 %v1048_v20 }
 0x3d2   : > { %v2838_v3 = vpop.f32.mrb[16].mxu0 }
 0x3d3   : > { %v2840_v28 = vpop.f32.mrb[17].mxu0 }
 0x3d4   : > { %v2844_v5 = vpop.f32.mrb[18].mxu0  ;;  %v1114_v32 = vsel %vm245_vm0, %v2840_v28, -inf }
 0x3d5   : > { %1052 = vmax.xlane.f32.xlu1 %v1051_v4  ;;  %v2846_v21 = vpop.f32.mrb[19].mxu0  ;;  %v1123_v20 = vsel %vm245_vm0, %v2844_v5, -inf  ;;  %v1120_v4 = vsel %vm245_vm0, %v2838_v3, -inf }
 0x3d6   : > { %v1117_v44 = vsel %vm245_vm0, %v2846_v21, -inf }
 0x3da   : > { %v2848_v29 = vpop.f32.mrb[0].mxu1  ;;  %v2850_v38 = vpop.f32.mrb[20].mxu0 }
 0x3db   : > { %v2852_v40 = vpop.f32.mrb[1].mxu1  ;;  %v2854_v7 = vpop.f32.mrb[21].mxu0  ;;  %v1060_v2 = vsel %vm245_vm0, %v2848_v29, -inf }
 0x3dc   : > { %v2856_v8 = vpop.f32.mrb[2].mxu1  ;;  %v1054_v51 = vsel %vm245_vm0, %v2852_v40, -inf  ;;  %v2860_v9 = vpop.f32.mrb[22].mxu0 }
 0x3dd   : > { %v2862_v53 = vpop.f32.mrb[3].mxu1  ;;  %1055 = vmax.xlane.f32.xlu1 %v1054_v51  ;;  %v2864_v10 = vpop.f32.mrb[23].mxu0  ;;  %v1063_v30 = vsel %vm245_vm0, %v2856_v8, -inf }
 0x3de   : > { %v1057_v17 = vsel %vm245_vm0, %v2862_v53, -inf  ;;  %v1129_v51 = vsel %vm245_vm0, %v2864_v10, -inf }
 0x3e2   : > { %v2866_v11 = vpop.f32.mrb[4].mxu1 }
 0x3e3   : > { %v2868_v12 = vpop.f32.mrb[5].mxu1  ;;  %v1072_v13 = vsel %vm245_vm0, %v2866_v11, -inf }
 0x3e4   : > { %v2872_v14 = vpop.f32.mrb[6].mxu1  ;;  %1073 = vmax.xlane.f32.xlu1 %v1072_v13  ;;  %v1066_v16 = vsel %vm245_vm0, %v2868_v12, -inf  ;;  %v1126_v13 = vsel %vm245_vm0, %v2854_v7, -inf }
 0x3e5   : > { %v2874_v15 = vpop.f32.mrb[7].mxu1  ;;  %v1075_v6 = vsel %vm245_vm0, %v2872_v14, -inf }
 0x3e6   : > { %1076 = vmax.xlane.f32.xlu0 %v1075_v6  ;;  %v1069_v24 = vsel %vm245_vm0, %v2874_v15, -inf }
 0x3e8   : > { %1067 = vmax.xlane.f32.xlu1 %v1066_v16 }
 0x3ea   : > { %v2882_v18 = vpop.f32.mrb[8].mxu1  ;;  %1058 = vmax.xlane.f32.xlu0 %v1057_v17 }
 0x3eb   : > { %v2884_v1 = vpop.f32.mrb[9].mxu1  ;;  %v1084_v42 = vsel %vm245_vm0, %v2882_v18, -inf }
 0x3ec   : > { %v2888_v19 = vpop.f32.mrb[10].mxu1  ;;  %1061 = vmax.xlane.f32.xlu1 %v1060_v2  ;;  %v1078_v33 = vsel %vm245_vm0, %v2884_v1, -inf }
 0x3ed   : > { %v2890_v22 = vpop.f32.mrb[11].mxu1  ;;  %v1087_v37 = vsel %vm245_vm0, %v2888_v19, -inf }
 0x3ee   : > { %v1081_v23 = vsel %vm245_vm0, %v2890_v22, -inf }
 0x3ef   : > { %1082 = vmax.xlane.f32.xlu0 %v1081_v23  ;;  %v1135_v23 = vsel %vm245_vm0, %v2860_v9, -inf }
 0x3f0   : > { %1070 = vmax.xlane.f32.xlu1 %v1069_v24  ;;  %v1132_v24 = vsel %vm245_vm0, %v2850_v38, -inf }
 0x3f2   : > { %v2896_v25 = vpop.f32.mrb[12].mxu1 }
 0x3f3   : > { %1064 = vmax.xlane.f32.xlu0 %v1063_v30  ;;  %v2900_v31 = vpop.f32.mrb[13].mxu1  ;;  %v1096_v55 = vsel %vm245_vm0, %v2896_v25, -inf }
 0x3f4   : > { %1079 = vmax.xlane.f32.xlu1 %v1078_v33  ;;  %v2904_v35 = vpop.f32.mrb[14].mxu1  ;;  %v1090_v0 = vsel %vm245_vm0, %v2900_v31, -inf }
 0x3f5   : > { %v2906_v36 = vpop.f32.mrb[15].mxu1  ;;  %v1099_v62 = vsel %vm245_vm0, %v2904_v35, -inf }
 0x3f6   : > { %v1093_v50 = vsel %vm245_vm0, %v2906_v36, -inf }
 0x3f7   : > { %1088 = vmax.xlane.f32.xlu0 %v1087_v37 }
 0x3f8   : > { %1085 = vmax.xlane.f32.xlu1 %v1084_v42 }
 0x3fa   : > { %v2914_v46 = vpop.f32.mrb[16].mxu1 }
 0x3fb   : > { %1118 = vmax.xlane.f32.xlu0 %v1117_v44  ;;  %v2918_v47 = vpop.f32.mrb[17].mxu1  ;;  %v1108_v16 = vsel %vm245_vm0, %v2914_v46, -inf }
 0x3fc   : > { %1115 = vmax.xlane.f32.xlu1 %v1114_v32  ;;  %v2920_v49 = vpop.f32.mrb[18].mxu1  ;;  %v1102_v2 = vsel %vm245_vm0, %v2918_v47, -inf }
 0x3fd   : > { %v2922_v34 = vpop.f32.mrb[19].mxu1  ;;  %v1111_v17 = vsel %vm245_vm0, %v2920_v49, -inf }
 0x3fe   : > { %v1105_v6 = vsel %vm245_vm0, %v2922_v34, -inf }
 0x3ff   : > { %1094 = vmax.xlane.f32.xlu0 %v1093_v50 }
 0x400   : > { %1097 = vmax.xlane.f32.xlu1 %v1096_v55 }
 0x403   : > { %1100 = vmax.xlane.f32.xlu0 %v1099_v62 }
 0x404   : > { %1091 = vmax.xlane.f32.xlu1 %v1090_v0 }
 0x407   : > { %1124 = vmax.xlane.f32.xlu0 %v1123_v20 }
 0x408   : > { %1121 = vmax.xlane.f32.xlu1 %v1120_v4 }
 0x40b   : > { %1130 = vmax.xlane.f32.xlu0 %v1129_v51 }
 0x40c   : > { %1127 = vmax.xlane.f32.xlu1 %v1126_v13 }
 0x40f   : > { %1106 = vmax.xlane.f32.xlu0 %v1105_v6 }
 0x410   : > { %1109 = vmax.xlane.f32.xlu1 %v1108_v16 }
 0x413   : > { %1112 = vmax.xlane.f32.xlu0 %v1111_v17 }
 0x414   : > { %1103 = vmax.xlane.f32.xlu1 %v1102_v2 }
 0x417   : > { %1136 = vmax.xlane.f32.xlu0 %v1135_v23 }
 0x418   : > { %1133 = vmax.xlane.f32.xlu1 %v1132_v24 }
 0x45a   : > { %v1044_v30 = vpop.xlane.xlu1 %1043 }
 0x45b   : > { %v1138_v33 = vsub.f32 %v2826_v60, %v1044_v30 }
 0x45c   : > { %v1047_v37 = vpop.xlane.xlu0 %1046 }
 0x45d   : > { %v1170_v32 = vmul.f32 1.442695, %v1138_v33  ;;  %v1139_v50 = vsub.f32 %v2832_v63, %v1047_v37 }
 0x45e   : > { %v1050_v42 = vpop.xlane.xlu1 %1049 }
 0x45f   : > { %v1140_v44 = vsub.f32 %v2824_v59, %v1050_v42  ;;  %v1172_v20 = vmul.f32 1.442695, %v1139_v50 }
 0x461   : > { %v1174_v55 = vmul.f32 1.442695, %v1140_v44 }
 0x462   : > { %v1053_v62 = vpop.xlane.xlu1 %1052 }
 0x463   : > { %2247 = vpow2.f32 %v1174_v55  ;;  %v1141_v0 = vsub.f32 %v2828_v61, %v1053_v62 }
 0x464   : > { %2249 = vpow2.f32 %v1170_v32 }
 0x465   : > { %v1176_v4 = vmul.f32 1.442695, %v1141_v0 }
 0x467   : > { %2251 = vpow2.f32 %v1176_v4 }
 0x468   : > { %2253 = vpow2.f32 %v1172_v20 }
 0x46a   : > { %v1056_v51 = vpop.xlane.xlu1 %1055 }
 0x46b   : > { %v1142_v60 = vsub.f32 %v2852_v40, %v1056_v51 }
 0x46d   : > { %v2957_v13 = vpop.eup %2247  ;;  %v1178_v6 = vmul.f32 1.442695, %v1142_v60 }
 0x46e   : > { %v1240_v59 = vsel %vm245_vm0, %v2957_v13, 0.0  ;;  %v2961_v63 = vpop.eup %2249 }
 0x46f   : > { %2255 = vpow2.f32 %v1178_v6  ;;  %1241 = vadd.xlane.f32.xlu1 %v1240_v59  ;;  %v1234_v2 = vsel %vm245_vm0, %v2961_v63, 0.0 }
 0x471   : > { %v2963_v16 = vpop.eup %2251  ;;  %v1074_v61 = vpop.xlane.xlu1 %1073 }
 0x472   : > { %v1148_v17 = vsub.f32 %v2866_v11, %v1074_v61  ;;  %v1243_v40 = vsel %vm245_vm0, %v2963_v16, 0.0  ;;  %v2970_v23 = vpop.eup %2253 }
 0x473   : > { %v1077_v24 = vpop.xlane.xlu0 %1076  ;;  %1235 = vadd.xlane.f32.xlu1 %v1234_v2  ;;  %1244 = vadd.xlane.f32.xlu0 %v1243_v40  ;;  %v1237_v11 = vsel %vm245_vm0, %v2970_v23, 0.0 }
 0x474   : > { %v1190_v30 = vmul.f32 1.442695, %v1148_v17  ;;  %v1149_v33 = vsub.f32 %v2872_v14, %v1077_v24 }
 0x475   : > { %v1068_v37 = vpop.xlane.xlu1 %1067 }
 0x476   : > { %2257 = vpow2.f32 %v1190_v30  ;;  %v1192_v42 = vmul.f32 1.442695, %v1149_v33  ;;  %v1146_v44 = vsub.f32 %v2868_v12, %v1068_v37 }
 0x477   : > { %v1059_v32 = vpop.xlane.xlu0 %1058  ;;  %1238 = vadd.xlane.f32.xlu0 %v1237_v11 }
 0x478   : > { %2259 = vpow2.f32 %v1192_v42  ;;  %v1186_v50 = vmul.f32 1.442695, %v1146_v44  ;;  %v1143_v20 = vsub.f32 %v2862_v53, %v1059_v32 }
 0x479   : > { %v2976_v55 = vpop.eup %2255  ;;  %v1062_v62 = vpop.xlane.xlu1 %1061 }
 0x47a   : > { %2261 = vpow2.f32 %v1186_v50  ;;  %v1144_v0 = vsub.f32 %v2848_v29, %v1062_v62  ;;  %v1246_v14 = vsel %vm245_vm0, %v2976_v55, 0.0  ;;  %v1180_v59 = vmul.f32 1.442695, %v1143_v20 }
 0x47b   : > { %1247 = vadd.xlane.f32.xlu1 %v1246_v14 }
 0x47c   : > { %v1182_v12 = vmul.f32 1.442695, %v1144_v0  ;;  %v1083_v4 = vpop.xlane.xlu0 %1082 }
 0x47d   : > { %v1071_v51 = vpop.xlane.xlu1 %1070  ;;  %v1151_v44 = vsub.f32 %v2890_v22, %v1083_v4 }
 0x47e   : > { %2263 = vpow2.f32 %v1182_v12  ;;  %v1147_v60 = vsub.f32 %v2874_v15, %v1071_v51 }
 0x47f   : > { %v1196_v20 = vmul.f32 1.442695, %v1151_v44 }
 0x480   : > { %v2983_v6 = vpop.eup %2257  ;;  %v1188_v61 = vmul.f32 1.442695, %v1147_v60  ;;  %v1065_v17 = vpop.xlane.xlu0 %1064 }
 0x481   : > { %v1145_v2 = vsub.f32 %v2856_v8, %v1065_v17  ;;  %v1080_v29 = vpop.xlane.xlu1 %1079  ;;  %v1264_v40 = vsel %vm245_vm0, %v2983_v6, 0.0 }
 0x482   : > { %v2988_v24 = vpop.eup %2259  ;;  %2265 = vpow2.f32 %v1188_v61  ;;  %1265 = vadd.xlane.f32.xlu1 %v1264_v40  ;;  %v1150_v12 = vsub.f32 %v2884_v1, %v1080_v29 }
 0x483   : > { %v1267_v53 = vsel %vm245_vm0, %v2988_v24, 0.0  ;;  %2267 = vpow2.f32 %v1180_v59  ;;  %v1184_v15 = vmul.f32 1.442695, %v1145_v2 }
 0x484   : > { %v2992_v30 = vpop.eup %2261  ;;  %v1089_v33 = vpop.xlane.xlu0 %1088  ;;  %1268 = vadd.xlane.f32.xlu0 %v1267_v53 }
 0x485   : > { %v1153_v37 = vsub.f32 %v2888_v19, %v1089_v33  ;;  %v1086_v8 = vpop.xlane.xlu1 %1085  ;;  %v1258_v42 = vsel %vm245_vm0, %v2992_v30, 0.0  ;;  %2269 = vpow2.f32 %v1184_v15 }
 0x486   : > { %1259 = vadd.xlane.f32.xlu1 %v1258_v42  ;;  %v1152_v50 = vsub.f32 %v2882_v18, %v1086_v8  ;;  %v2493_v42 = vmov 0.0  }
 0x487   : > { %v1200_v32 = vmul.f32 1.442695, %v1153_v37  ;;  %1975 = vmatprep.subr.bf16.mxu1 %v2493_v42  ;;  %1987 = vmatprep.subr.bf16.mxu0 %v2493_v42 }
 0x488   : > { %v2998_v11 = vpop.eup %2263  ;;  %v1119_v62 = vpop.xlane.xlu0 %1118  ;;  %v1198_v22 = vmul.f32 1.442695, %v1152_v50  ;;  %1983 = vmatprep.mubr.msk.bf16.mxu1 %vm2494_vm3, %v2493_v42  ;;  %1995 = vmatprep.mubr.msk.bf16.mxu0 %vm2494_vm3, %v2493_v42 }
 0x489   : > { %v1116_v0 = vpop.xlane.xlu1 %1115  ;;  %v1252_v14 = vsel %vm245_vm0, %v2998_v11, 0.0  ;;  %2271 = vpow2.f32 %v1200_v32  ;;  %v1163_v4 = vsub.f32 %v2846_v21, %v1119_v62 }
 0x48a   : > { %v1162_v19 = vsub.f32 %v2840_v28, %v1116_v0  ;;  %1253 = vadd.xlane.f32.xlu1 %v1252_v14  ;;  %v1194_v28 = vmul.f32 1.442695, %v1150_v12 }
 0x48b   : > { %v1220_v1 = vmul.f32 1.442695, %v1163_v4 }
 0x48c   : > { %v3005_v51 = vpop.eup %2265  ;;  %v1218_v60 = vmul.f32 1.442695, %v1162_v19  ;;  %v1095_v59 = vpop.xlane.xlu0 %1094 }
 0x48d   : > { %v1098_v18 = vpop.xlane.xlu1 %1097  ;;  %v1261_v61 = vsel %vm245_vm0, %v3005_v51, 0.0  ;;  %v3010_v17 = vpop.eup %2267  ;;  %v1155_v50 = vsub.f32 %v2906_v36, %v1095_v59 }
 0x48e   : > { %2273 = vpow2.f32 %v1218_v60  ;;  %1262 = vadd.xlane.f32.xlu0 %v1261_v61  ;;  %v1249_v40 = vsel %vm245_vm0, %v3010_v17, 0.0 }
 0x48f   : > { %2275 = vpow2.f32 %v1196_v20  ;;  %v3014_v21 = vpop.eup %2269 }
 0x490   : > { %2277 = vpow2.f32 %v1198_v22  ;;  %v1101_v2 = vpop.xlane.xlu0 %1100  ;;  %v1255_v8 = vsel %vm245_vm0, %v3014_v21, 0.0 }
 0x491   : > { %v1092_v29 = vpop.xlane.xlu1 %1091  ;;  %2279 = vpow2.f32 %v1194_v28  ;;  %v1157_v53 = vsub.f32 %v2904_v35, %v1101_v2 }
 0x492   : > { %1250 = vadd.xlane.f32.xlu0 %v1249_v40  ;;  %2281 = vpow2.f32 %v1220_v1  ;;  %v1154_v60 = vsub.f32 %v2900_v31, %v1092_v29 }
 0x493   : > { %v3022_v44 = vpop.eup %2271  ;;  %v1208_v0 = vmul.f32 1.442695, %v1157_v53 }
 0x494   : > { %v1125_v15 = vpop.xlane.xlu0 %1124  ;;  %v1202_v31 = vmul.f32 1.442695, %v1154_v60 }
 0x495   : > { %v1165_v33 = vsub.f32 %v2844_v5, %v1125_v15  ;;  %v1122_v37 = vpop.xlane.xlu1 %1121  ;;  %v1156_v5 = vsub.f32 %v2896_v25, %v1098_v18  ;;  %v1204_v25 = vmul.f32 1.442695, %v1155_v50 }
 0x496   : > { %v1164_v32 = vsub.f32 %v2838_v3, %v1122_v37  ;;  %1256 = vadd.xlane.f32.xlu0 %v1255_v8  ;;  %v1279_v3 = vsel %vm245_vm0, %v3022_v44, 0.0 }
 0x497   : > { %v1224_v35 = vmul.f32 1.442695, %v1165_v33  ;;  %v1206_v59 = vmul.f32 1.442695, %v1156_v5 }
 0x498   : > { %v3026_v62 = vpop.eup %2273  ;;  %v1222_v14 = vmul.f32 1.442695, %v1164_v32  ;;  %v1131_v19 = vpop.xlane.xlu0 %1130 }
 0x499   : > { %v3029_v20 = vpop.eup %2275  ;;  %2283 = vpow2.f32 %v1224_v35  ;;  %v1128_v12 = vpop.xlane.xlu1 %1127  ;;  %v1306_v22 = vsel %vm245_vm0, %v3026_v62, 0.0  ;;  %v1167_v18 = vsub.f32 %v2864_v10, %v1131_v19 }
 0x49a   : > { %v3035_v4 = vpop.eup %2277  ;;  %2285 = vpow2.f32 %v1222_v14  ;;  %v1166_v36 = vsub.f32 %v2854_v7, %v1128_v12  ;;  %1307 = vadd.xlane.f32.xlu1 %v1306_v22  ;;  %1280 = vadd.xlane.f32.xlu0 %v1279_v3  ;;  %v1273_v7 = vsel %vm245_vm0, %v3029_v20, 0.0 }
 0x49b   : > { %2287 = vpow2.f32 %v1208_v0  ;;  %v3040_v1 = vpop.eup %2279  ;;  %v1276_v40 = vsel %vm245_vm0, %v3035_v4, 0.0  ;;  %v1228_v10 = vmul.f32 1.442695, %v1167_v18 }
 0x49c   : > { %v1226_v61 = vmul.f32 1.442695, %v1166_v36  ;;  %v1107_v28 = vpop.xlane.xlu0 %1106  ;;  %v3046_v53 = vpop.eup %2281  ;;  %v1270_v33 = vsel %vm245_vm0, %v3040_v1, 0.0 }
 0x49d   : > { %v1110_v2 = vpop.xlane.xlu1 %1109  ;;  %v1309_v37 = vsel %vm245_vm0, %v3046_v53, 0.0  ;;  %v1159_v12 = vsub.f32 %v2922_v34, %v1107_v28 }
 0x49e   : > { %2289 = vpow2.f32 %v1226_v61  ;;  %1277 = vadd.xlane.f32.xlu1 %v1276_v40  ;;  %1274 = vadd.xlane.f32.xlu0 %v1273_v7  ;;  %v1160_v29 = vsub.f32 %v2914_v46, %v1110_v2 }
 0x49f   : > { %2291 = vpow2.f32 %v1204_v25 }
 0x4a0   : > { %2293 = vpow2.f32 %v1206_v59  ;;  %v1113_v15 = vpop.xlane.xlu0 %1112  ;;  %v1214_v35 = vmul.f32 1.442695, %v1160_v29  ;;  %v1212_v59 = vmul.f32 1.442695, %v1159_v12 }
 0x4a1   : > { %2295 = vpow2.f32 %v1202_v31  ;;  %v3055_v32 = vpop.xlane.xlu1 %1103  ;;  %v1161_v46 = vsub.f32 %v2920_v49, %v1113_v15 }
 0x4a2   : > { %1271 = vadd.xlane.f32.xlu1 %v1270_v33  ;;  %1310 = vadd.xlane.f32.xlu0 %v1309_v37  ;;  %2297 = vpow2.f32 %v1228_v10 }
 0x4a3   : > { %v3053_v8 = vpop.eup %2283  ;;  %2299 = vpow2.f32 %v1214_v35  ;;  %v1216_v22 = vmul.f32 1.442695, %v1161_v46  ;;  %v375_v46 = vunpack.c.l.bf16 %v2754_v26 }
 0x4a4   : > { %v3057_v50 = vpop.eup %2285  ;;  %v1315_v5 = vsel %vm245_vm0, %v3053_v8, 0.0  ;;  %v1137_v61 = vpop.xlane.xlu0 %1136 }
 0x4a5   : > { %v1312_v0 = vsel %vm245_vm0, %v3057_v50, 0.0  ;;  %v3064_v14 = vpop.eup %2287  ;;  %v1134_v36 = vpop.xlane.xlu1 %1133  ;;  %2301 = vpow2.f32 %v1216_v22  ;;  %v1169_v7 = vsub.f32 %v2860_v9, %v1137_v61 }
 0x4a6   : > { %1313 = vadd.xlane.f32.xlu1 %v1312_v0  ;;  %1316 = vadd.xlane.f32.xlu0 %v1315_v5  ;;  %v1291_v25 = vsel %vm245_vm0, %v3064_v14, 0.0  ;;  %v1168_v18 = vsub.f32 %v2850_v38, %v1134_v36  ;;  %2303 = vpow2.f32 %v1212_v59  ;;  %v376_v5 = vunpack.c.h.bf16 %v2754_v26 }
 0x4a7   : > { %v1232_v15 = vmul.f32 1.442695, %v1169_v7  ;;  %v1158_v26 = vsub.f32 %v2918_v47, %v3055_v32 }
 0x4a8   : > { %v3066_v19 = vpop.eup %2289  ;;  %v1230_v31 = vmul.f32 1.442695, %v1168_v18  ;;  %v2201_v22 = vpack.i.bf16 %v376_v5, %v375_v46 }
 0x4a9   : > { %v3069_v3 = vpop.eup %2291  ;;  %v1318_v49 = vsel %vm245_vm0, %v3066_v19, 0.0  ;;  %v1210_v59 = vmul.f32 1.442695, %v1158_v26 }
 0x4aa   : > { %v3075_v60 = vpop.eup %2293  ;;  %1319 = vadd.xlane.f32.xlu1 %v1318_v49  ;;  %1292 = vadd.xlane.f32.xlu0 %v1291_v25  ;;  %v1285_v2 = vsel %vm245_vm0, %v3069_v3, 0.0  ;;  %2305 = vpow2.f32 %v1230_v31 }
 0x4ab   : > { %v3078_v34 = vpop.eup %2295  ;;  %v1288_v28 = vsel %vm245_vm0, %v3075_v60, 0.0  ;;  %2307 = vpow2.f32 %v1232_v15 }
 0x4ac   : > { %v3084_v40 = vpop.eup %2297  ;;  %v1282_v38 = vsel %vm245_vm0, %v3078_v34, 0.0  ;;  %2309 = vpow2.f32 %v1210_v59 }
 0x4ad   : > { %v1321_v10 = vsel %vm245_vm0, %v3084_v40, 0.0  ;;  %v3091_v29 = vpop.eup %2299 }
 0x4ae   : > { %1289 = vadd.xlane.f32.xlu1 %v1288_v28  ;;  %1286 = vadd.xlane.f32.xlu0 %v1285_v2  ;;  %v1300_v33 = vsel %vm245_vm0, %v3091_v29, 0.0  ;;  %v377_v28 = vunpack.c.l.bf16 %v2759_v27  ;;  %v378_v2 = vunpack.c.h.bf16 %v2759_v27 }
 0x4af   : > { %v3095_v37 = vpop.eup %2301 }
 0x4b0   : > { %v1303_v9 = vsel %vm245_vm0, %v3095_v37, 0.0  ;;  %v3099_v35 = vpop.eup %2303  ;;  %v2206_v7 = vpack.i.bf16 %v378_v2, %v377_v28 }
 0x4b1   : > { %v1297_v0 = vsel %vm245_vm0, %v3099_v35, 0.0 }
 0x4b2   : > { %1283 = vadd.xlane.f32.xlu1 %v1282_v38  ;;  %1322 = vadd.xlane.f32.xlu0 %v1321_v10 }
 0x4b4   : > { %v3105_v12 = vpop.eup %2305 }
 0x4b5   : > { %v1324_v36 = vsel %vm245_vm0, %v3105_v12, 0.0  ;;  %v3109_v49 = vpop.eup %2307 }
 0x4b6   : > { %1301 = vadd.xlane.f32.xlu0 %v1300_v33  ;;  %v1327_v25 = vsel %vm245_vm0, %v3109_v49, 0.0  ;;  %v3119_v18 = vpop.eup %2309 }
 0x4b7   : > { %v1294_v61 = vsel %vm245_vm0, %v3119_v18, 0.0 }
 0x4ba   : > { %1304 = vadd.xlane.f32.xlu0 %v1303_v9 }
 0x4be   : > { %1298 = vadd.xlane.f32.xlu0 %v1297_v0 }
 0x4c2   : > { %1325 = vadd.xlane.f32.xlu0 %v1324_v36 }
 0x4c3   : > { %2202 = vperm.xlu1 %2101, %v2201_v22  }
 0x4c6   : > { %1328 = vadd.xlane.f32.xlu0 %v1327_v25 }
 0x4e7   : > { %1295 = vadd.xlane.f32.xlu1 %v1294_v61 }
 0x4f8   : > { %2207 = vperm.xlu1 %2101, %v2206_v7  }
 0x4fc   : > { %v1242_v31 = vpop.xlane.xlu1 %1241 }
 0x500   : > { %v1236_v38 = vpop.xlane.xlu1 %1235  ;;  %v1245_v10 = vpop.xlane.xlu0 %1244 }
 0x501   : > { %2311 = vrcp.f32 %v1236_v38 }
 0x504   : > { %v1239_v15 = vpop.xlane.xlu0 %1238 }
 0x505   : > { %2313 = vrcp.f32 %v1239_v15 }
 0x506   : > { %2315 = vrcp.f32 %v1245_v10 }
 0x507   : > { %2317 = vrcp.f32 %v1242_v31 }
 0x508   : > { %v1248_v32 = vpop.xlane.xlu1 %1247 }
 0x50b   : > { %v2312_v47 = vpop.eup %2311 }
 0x50c   : > { %v1362_v9 = vmul.f32 %v2312_v47, %v2961_v63 }
 0x50f   : > { %v2314_v33 = vpop.eup %2313  ;;  %v1266_v0 = vpop.xlane.xlu1 %1265 }
 0x510   : > { %v1363_v46 = vmul.f32 %v2314_v33, %v2970_v23  ;;  %v2316_v5 = vpop.eup %2315 }
 0x511   : > { %v2318_v22 = vpop.eup %2317  ;;  %v1365_v25 = vmul.f32 %v2316_v5, %v2963_v16  ;;  %v1269_v59 = vpop.xlane.xlu0 %1268 }
 0x512   : > { %v1394_v27 = vpack.c.bf16 %v1363_v46, %v1362_v9  ;;  %v1364_v26 = vmul.f32 %v2318_v22, %v2957_v13 }
 0x513   : > { %v1260_v61 = vpop.xlane.xlu1 %1259 }
 0x514   : > { %v1414_v36 = vsel %vm245_vm0, %v1394_v27, 0  ;;  %v1395_v28 = vpack.c.bf16 %v1365_v25, %v1364_v26  ;;  %2319 = vrcp.f32 %v1260_v61 }
 0x515   : > { %1976 = vmatpush3.bf16.xpose.msra.mxu1 %v1414_v36 }
 0x516   : > { %1977 = vmatprep.subr.bf16.mxu1 %v2493_v42  ;;  %v1417_v23 = vsel %vm245_vm0, %v1395_v28, 0 }
 0x517   : > { %v1254_v2 = vpop.xlane.xlu1 %1253 }
 0x51b   : > { %v1263_v63 = vpop.xlane.xlu0 %1262 }
 0x51c   : > { %2321 = vrcp.f32 %v1263_v63 }
 0x51d   : > { %2323 = vrcp.f32 %v1248_v32  ;;  %1978 = vmatpush3.bf16.xpose.msra.mxu1 %v1417_v23 }
 0x51e   : > { %2325 = vrcp.f32 %v1269_v59  ;;  %1979 = vmatprep.subr.bf16.mxu1 %v2493_v42  ;;  %v2320_v13 = vpop.eup %2319 }
 0x51f   : > { %2327 = vrcp.f32 %v1266_v0  ;;  %v1251_v16 = vpop.xlane.xlu0 %1250  ;;  %v1370_v47 = vmul.f32 %v2320_v13, %v2992_v30 }
 0x520   : > { %2329 = vrcp.f32 %v1251_v16 }
 0x521   : > { %2331 = vrcp.f32 %v1254_v2 }
 0x523   : > { %v1257_v7 = vpop.xlane.xlu0 %1256 }
 0x524   : > { %2333 = vrcp.f32 %v1257_v7 }
 0x526   : > { %v2322_v31 = vpop.eup %2321 }
 0x527   : > { %v2324_v38 = vpop.eup %2323  ;;  %v1308_v10 = vpop.xlane.xlu1 %1307  ;;  %v1371_v32 = vmul.f32 %v2322_v31, %v3005_v51 }
 0x528   : > { %v1281_v15 = vpop.xlane.xlu0 %1280  ;;  %v2326_v33 = vpop.eup %2325  ;;  %v1366_v36 = vmul.f32 %v2324_v38, %v2976_v55 }
 0x529   : > { %v2328_v9 = vpop.eup %2327  ;;  %v1398_v46 = vpack.c.bf16 %v1371_v32, %v1370_v47  ;;  %v1373_v26 = vmul.f32 %v2326_v33, %v2988_v24 }
 0x52a   : > { %v2330_v5 = vpop.eup %2329  ;;  %v1372_v30 = vmul.f32 %v2328_v9, %v2983_v6 }
 0x52b   : > { %v1278_v0 = vpop.xlane.xlu1 %1277  ;;  %v1469_v22 = vsel %vm245_vm0, %v1398_v46, 0  ;;  %v1367_v25 = vmul.f32 %v2330_v5, %v3010_v17  ;;  %v2332_v59 = vpop.eup %2331 }
 0x52c   : > { %v1275_v27 = vpop.xlane.xlu0 %1274  ;;  %1988 = vmatpush3.bf16.xpose.msra.mxu0 %v1469_v22  ;;  %v1399_v16 = vpack.c.bf16 %v1373_v26, %v1372_v30  ;;  %v1368_v24 = vmul.f32 %v2332_v59, %v2998_v11 }
 0x52d   : > { %v1396_v61 = vpack.c.bf16 %v1367_v25, %v1366_v36  ;;  %1989 = vmatprep.subr.bf16.mxu0 %v2493_v42  ;;  %2335 = vrcp.f32 %v1275_v27 }
 0x52e   : > { %v2334_v51 = vpop.eup %2333  ;;  %v1472_v6 = vsel %vm245_vm0, %v1399_v16, 0 }
 0x52f   : > { %v1272_v28 = vpop.xlane.xlu1 %1271  ;;  %v1420_v23 = vsel %vm245_vm0, %v1396_v61, 0  ;;  %v1369_v55 = vmul.f32 %v2334_v51, %v3014_v21 }
 0x530   : > { %v1311_v63 = vpop.xlane.xlu0 %1310  ;;  %2337 = vrcp.f32 %v1272_v28  ;;  %1980 = vmatpush3.bf16.xpose.msra.mxu1 %v1420_v23 }
 0x531   : > { %1981 = vmatprep.subr.bf16.mxu1 %v2493_v42  ;;  %2339 = vrcp.f32 %v1278_v0  ;;  %v1397_v7 = vpack.c.bf16 %v1369_v55, %v1368_v24 }
 0x532   : > { %2341 = vrcp.f32 %v1281_v15 }
 0x533   : > { %v1314_v17 = vpop.xlane.xlu1 %1313  ;;  %v1423_v21 = vsel %vm245_vm0, %v1397_v7, 0  ;;  %2343 = vrcp.f32 %v1311_v63 }
 0x534   : > { %v1317_v2 = vpop.xlane.xlu0 %1316  ;;  %1990 = vmatpush3.bf16.xpose.msra.mxu0 %v1472_v6  ;;  %2345 = vrcp.f32 %v1308_v10 }
 0x535   : > { %1991 = vmatprep.subr.bf16.mxu0 %v2493_v42 }
 0x537   : > { %v1320_v13 = vpop.xlane.xlu1 %1319  ;;  %v2336_v38 = vpop.eup %2335 }
 0x538   : > { %v1293_v31 = vpop.xlane.xlu0 %1292  ;;  %1982 = vmatpush3.bf16.xpose.msra.mxu1 %v1423_v21  ;;  %v1375_v9 = vmul.f32 %v2336_v38, %v3029_v20 }
 0x539   : > { %1999 = vmatprep.subr.bf16.mxu1 %v2493_v42 }
 0x53a   : > { %v2338_v47 = vpop.eup %2337 }
 0x53b   : > { %v1290_v11 = vpop.xlane.xlu1 %1289  ;;  %v1374_v33 = vmul.f32 %v2338_v47, %v3040_v1  ;;  %v2340_v15 = vpop.eup %2339 }
 0x53c   : > { %v1287_v32 = vpop.xlane.xlu0 %1286  ;;  %v2342_v5 = vpop.eup %2341  ;;  %v1376_v36 = vmul.f32 %v2340_v15, %v3035_v4 }
 0x53d   : > { %v1400_v46 = vpack.c.bf16 %v1375_v9, %v1374_v33  ;;  %2347 = vrcp.f32 %v1287_v32  ;;  %v1377_v1 = vmul.f32 %v2342_v5, %v3022_v44  ;;  %v2344_v26 = vpop.eup %2343 }
 0x53e   : > { %2349 = vrcp.f32 %v1314_v17  ;;  %v2346_v59 = vpop.eup %2345  ;;  %v1387_v51 = vmul.f32 %v2344_v26, %v3046_v53 }
 0x53f   : > { %v1284_v0 = vpop.xlane.xlu1 %1283  ;;  %v1475_v22 = vsel %vm245_vm0, %v1400_v46, 0  ;;  %v1401_v25 = vpack.c.bf16 %v1377_v1, %v1376_v36  ;;  %v1386_v16 = vmul.f32 %v2346_v59, %v3026_v62 }
 0x540   : > { %v1323_v27 = vpop.xlane.xlu0 %1322  ;;  %2351 = vrcp.f32 %v1284_v0  ;;  %1992 = vmatpush3.bf16.xpose.msra.mxu0 %v1475_v22 }
 0x541   : > { %2353 = vrcp.f32 %v1317_v2  ;;  %1993 = vmatprep.subr.bf16.mxu0 %v2493_v42  ;;  %v1478_v4 = vsel %vm245_vm0, %v1401_v25, 0  ;;  %v1406_v2 = vpack.c.bf16 %v1387_v51, %v1386_v16  ;;  %v2495_v16 = vmov 96  }
 0x542   : > { %2355 = vrcp.f32 %v1290_v11  ;;  %2211 = vset.pattern.permute.xlu0 %v2495_v16 }
 0x543   : > { %v2203_v20 = vpop.permute.xlu1 %2202  ;;  %2357 = vrcp.f32 %v1293_v31 }
 0x544   : > { %v3155_v10 = vpop.xlane.xlu0 %1301  ;;  %v2385_v61 = vadd.low.f32.bf16 %v2818_v57, %v2203_v20  ;;  %v2386_v23 = vadd.high.f32.bf16 %v2822_v58, %v2203_v20  ;;  %2359 = vrcp.f32 %v1323_v27 }
 0x545   : > { %2361 = vrcp.f32 %v1320_v13 }
 0x546   : > { %v716_v63 = vpack.c.bf16 %v2385_v61, %v2385_v61  ;;  %v717_v58 = vpack.c.bf16 %v2386_v23, %v2386_v23 }
 0x547   : > { %v2348_v28 = vpop.eup %2347 }
 0x548   : > { %v3158_v30 = vpop.xlane.xlu0 %1304  ;;  %1994 = vmatpush3.bf16.xpose.msra.mxu0 %v1478_v4  ;;  %v2350_v44 = vpop.eup %2349  ;;  %1984 = vmatmul.mubr.msk.bf16.vlgmr.msra.gmra.mrb[20].mxu1 %vm245_vm0, %v716_v63  ;;  %v1379_v53 = vmul.f32 %v2348_v28, %v3069_v3 }
 0x549   : > { %2011 = vmatprep.subr.bf16.mxu0 %v2493_v42  ;;  %2007 = vmatprep.mubr.msk.bf16.mxu1 %vm2494_vm3, %v2493_v42  ;;  %v1388_v62 = vmul.f32 %v2350_v44, %v3057_v50 }
 0x54a   : > { %v2352_v55 = vpop.eup %2351 }
 0x54b   : > { %v2354_v57 = vpop.eup %2353  ;;  %v1378_v17 = vmul.f32 %v2352_v55, %v3078_v34  ;;  %v1579_v34 = vsel %vm245_vm0, %v1406_v2, 0 }
 0x54c   : > { %v1299_v24 = vpop.xlane.xlu0 %1298  ;;  %v2356_v6 = vpop.eup %2355  ;;  %v1389_v47 = vmul.f32 %v2354_v57, %v3053_v8 }
 0x54d   : > { %v1402_v7 = vpack.c.bf16 %v1379_v53, %v1378_v17  ;;  %v2358_v31 = vpop.eup %2357  ;;  %v1380_v3 = vmul.f32 %v2356_v6, %v3075_v60 }
 0x54e   : > { %v1381_v13 = vmul.f32 %v2358_v31, %v3064_v14  ;;  %v1407_v32 = vpack.c.bf16 %v1389_v47, %v1388_v62  ;;  %v2360_v33 = vpop.eup %2359 }
 0x54f   : > { %1996 = vmatmul.mubr.msk.bf16.vlgmr.msra.gmra.mrb[24].mxu0 %vm245_vm0, %v717_v58  ;;  %v1524_v38 = vsel %vm245_vm0, %v1402_v7, 0  ;;  %v2362_v60 = vpop.eup %2361  ;;  %v1391_v15 = vmul.f32 %v2360_v33, %v3084_v40 }
 0x550   : > { %v1326_v21 = vpop.xlane.xlu0 %1325  ;;  %2000 = vmatpush3.bf16.xpose.msra.mxu1 %v1524_v38  ;;  %2012 = vmatpush3.bf16.xpose.msra.mxu0 %v1579_v34  ;;  %v1403_v11 = vpack.c.bf16 %v1381_v13, %v1380_v3  ;;  %v1582_v9 = vsel %vm245_vm0, %v1407_v32, 0  ;;  %v1390_v14 = vmul.f32 %v2362_v60, %v3066_v19  ;;  %v2376_v32 = vld [vmem:[%s2641_s23 + $0x8] sm:$0xff]  ;;  %v2377_v60 = vld [vmem:[%s2641_s23 + $0x10] sm:$0xff] }
 0x551   : > { %2001 = vmatprep.subr.bf16.mxu1 %v2493_v42  ;;  %2013 = vmatprep.subr.bf16.mxu0 %v2493_v42  ;;  %2363 = vrcp.f32 %v1326_v21 }
 0x552   : > { %2019 = vmatprep.mubr.msk.bf16.mxu0 %vm2494_vm3, %v2493_v42  ;;  %v1527_v8 = vsel %vm245_vm0, %v1403_v11, 0  ;;  %v1408_v46 = vpack.c.bf16 %v1391_v15, %v1390_v14  ;;  %v2375_v11 = vld [vmem:[%s2641_s23] sm:$0xff] }
 0x553   : > { %v1638_v33 = vpack.c.bf16 %v2376_v32, %v2375_v11 }
 0x554   : > { %v1329_v50 = vpop.xlane.xlu0 %1328  ;;  %v1585_v27 = vsel %vm245_vm0, %v1408_v46, 0 }
 0x555   : > { %2365 = vrcp.f32 %v1329_v50 }
 0x556   : > { %2367 = vrcp.f32 %v1299_v24 }
 0x558   : > { %2002 = vmatpush3.bf16.xpose.msra.mxu1 %v1527_v8  ;;  %2014 = vmatpush3.bf16.xpose.msra.mxu0 %v1582_v9  ;;  %v2378_v8 = vld [vmem:[%s2641_s23 + $0x18] sm:$0xff] }
 0x559   : > { %2015 = vmatprep.subr.bf16.mxu0 %v2493_v42  ;;  %2003 = vmatprep.subr.bf16.mxu1 %v2493_v42  ;;  %v1639_v9 = vpack.c.bf16 %v2378_v8, %v2377_v60 }
 0x55b   : > { %v2364_v5 = vpop.eup %2363 }
 0x55c   : > { %v1392_v40 = vmul.f32 %v2364_v5, %v3105_v12 }
 0x55f   : > { %v2366_v0 = vpop.eup %2365 }
 0x560   : > { %v1393_v22 = vmul.f32 %v2366_v0, %v3109_v49  ;;  %2016 = vmatpush3.bf16.xpose.msra.mxu0 %v1585_v27  ;;  %v2368_v49 = vpop.eup %2367 }
 0x561   : > { %2017 = vmatprep.subr.bf16.mxu0 %v2493_v42  ;;  %v1383_v61 = vmul.f32 %v2368_v49, %v3099_v35 }
 0x562   : > { %v1409_v36 = vpack.c.bf16 %v1393_v22, %v1392_v40 }
 0x564   : > { %v1588_v1 = vsel %vm245_vm0, %v1409_v36, 0 }
 0x568   : > { %2018 = vmatpush3.bf16.xpose.msra.mxu0 %v1588_v1 }
 0x574   : > { %v1296_v19 = vpop.xlane.xlu1 %1295 }
 0x575   : > { %2369 = vrcp.f32 %v1296_v19 }
 0x576   : > { %2371 = vrcp.f32 %v3158_v30 }
 0x577   : > { %2373 = vrcp.f32 %v3155_v10 }
 0x578   : > { %v2208_v20 = vpop.permute.xlu1 %2207 }
 0x579   : > { %v2387_v25 = vadd.high.f32.bf16 %v2820_v48, %v2208_v20 }
 0x57b   : > { %v719_v26 = vpack.c.bf16 %v2387_v25, %v2387_v25 }
 0x57d   : > { %2020 = vmatmul.mubr.msk.bf16.vlgmr.msra.gmra.mrb[28].mxu0 %vm245_vm0, %v719_v26 }
 0x57f   : > { %v2370_v59 = vpop.eup %2369 }
 0x580   : > { %v1382_v12 = vmul.f32 %v2370_v59, %v3119_v18  ;;  %v2372_v4 = vpop.eup %2371  ;;  %v2388_v18 = vadd.low.f32.bf16 %v2816_v43, %v2208_v20 }
 0x581   : > { %v2374_v28 = vpop.eup %2373  ;;  %v1385_v30 = vmul.f32 %v2372_v4, %v3095_v37  ;;  %v1640_v37 = vld [vmem:[%s3282_s3] sm:$0xff]  }
 0x582   : > { %v1404_v51 = vpack.c.bf16 %v1383_v61, %v1382_v12  ;;  %v1384_v48 = vmul.f32 %v2374_v28, %v3091_v29  ;;  %v718_v35 = vpack.c.bf16 %v2388_v18, %v2388_v18  ;;  %v1642_v23 = vunpack.c.l.bf16 %v1640_v37 }
 0x583   : > { %v1643_v29 = vunpack.c.h.bf16 %v1640_v37 }
 0x584   : > { %v1530_v63 = vsel %vm245_vm0, %v1404_v51, 0  ;;  %v1405_v10 = vpack.c.bf16 %v1385_v30, %v1384_v48 }
 0x585   : > { %2004 = vmatpush3.bf16.xpose.msra.mxu1 %v1530_v63  ;;  %v2212_v55 = vpack.i.bf16 %v1643_v29, %v1642_v23 }
 0x586   : > { %2005 = vmatprep.subr.bf16.mxu1 %v2493_v42  ;;  %v1533_v44 = vsel %vm245_vm0, %v1405_v10, 0 }
 0x587   : > { %2213 = vperm.xlu0 %2211, %v2212_v55  }
 0x58d   : > { %2006 = vmatpush3.bf16.xpose.msra.mxu1 %v1533_v44 }
 0x58e   : > { %2023 = vmatprep.subr.bf16.mxu1 %v2493_v42 }
 0x594   : > { %2008 = vmatmul.mubr.msk.bf16.vlgmr.msra.gmra.mrb[24].mxu1 %vm245_vm0, %v718_v35 }
 0x595   : > { %2035 = vmatprep.mubr.msk.bf16.mxu1 %vm2494_vm3, %v2493_v42 }
 0x606   : > { %v2214_v39 = vpop.permute.xlu0 %2213 }
 0x61b   : > { %v1459_v57 = vpop.f32.mrb[20].mxu1 }
 0x61c   : > { %v1985_v43 = vpop.f32.mrb[21].mxu1 }
 0x61d   : > { %v1462_v24 = vpop.f32.mrb[22].mxu1 }
 0x61e   : > { %v1986_v17 = vpop.f32.mrb[23].mxu1 }
 0x622   : > { %v1514_v53 = vpop.f32.mrb[24].mxu0 }
 0x623   : > { %v1634_v2 = vpack.c.bf16 %v1514_v53, %v1459_v57  ;;  %v1997_v6 = vpop.f32.mrb[25].mxu0 }
 0x624   : > { %v1517_v58 = vpop.f32.mrb[26].mxu0 }
 0x625   : > { %v1998_v7 = vpop.f32.mrb[27].mxu0  ;;  %2024 = vmatpush3.bf16.msra.mxu1 %v1634_v2 }
 0x626   : > { %2025 = vmatprep.subr.bf16.mxu1 %v2493_v42 }
 0x650   : > { %v1624_v31 = vpop.f32.mrb[28].mxu0 }
 0x651   : > { %v2021_v62 = vpop.f32.mrb[29].mxu0 }
 0x652   : > { %v1627_v21 = vpop.f32.mrb[30].mxu0 }
 0x653   : > { %v2022_v38 = vpop.f32.mrb[31].mxu0 }
 0x667   : > { %v1569_v34 = vpop.f32.mrb[24].mxu1 }
 0x668   : > { %v1635_v3 = vpack.c.bf16 %v1624_v31, %v1569_v34  ;;  %v2009_v47 = vpop.f32.mrb[25].mxu1 }
 0x669   : > { %v1572_v13 = vpop.f32.mrb[26].mxu1 }
 0x66a   : > { %v2010_v50 = vpop.f32.mrb[27].mxu1  ;;  %2026 = vmatpush3.bf16.msra.mxu1 %v1635_v3 }
 0x66b   : > { %2027 = vmatprep.subr.bf16.mxu1 %v2493_v42 }
 0x66e   : > { %2028 = vmatpush3.bf16.msra.mxu1 %v1636_v45 }
 0x66f   : > { %2029 = vmatprep.subr.bf16.mxu1 %v2493_v42 }
 0x672   : > { %2030 = vmatpush3.bf16.msra.mxu1 %v1637_v56 }
 0x673   : > { %2031 = vmatprep.subr.bf16.mxu1 %v2493_v42 }
 0x676   : > { %2032 = vmatpush3.bf16.msra.mxu1 %v1638_v33 }
 0x677   : > { %2033 = vmatprep.subr.bf16.mxu1 %v2493_v42 }
 0x67a   : > { %2034 = vmatpush3.bf16.msra.mxu1 %v1639_v9 }
 0x67d   : > { %2036 = vmatmul.mubr.msk.bf16.vlgmr.msra.gmra.mrb[28].mxu1 %vm1659_vm4, %v1640_v37 }
 0x750   : > { %v1697_v41 = vpop.f32.mrb[28].mxu1 }
 0x751   : > { %v2389_v45 = vadd.low.f32.bf16 %v1697_v41, %v2214_v39  ;;  %v2037_v52 = vpop.f32.mrb[29].mxu1 }
 0x752   : > { %v1700_v54 = vpop.f32.mrb[30].mxu1 }
 0x753   : > { %1704 = vst.msk [vmem:[%s230_s26] sm:$0xff] %vm245_vm0, %v2389_v45  ;;  %v2390_v56 = vadd.high.f32.bf16 %v1700_v54, %v2214_v39  ;;  %v2038_v42 = vpop.f32.mrb[31].mxu1 }
 0x755   : > { %1705 = vst.msk [vmem:[%s230_s26 + $0x8] sm:$0xff] %vm245_vm0, %v2390_v56 }
 0x756   : > { %2434 = shalt.err (!%p2431_p4)
}
 0x757   : > { %s2435_s20 = scalar_lea.hbm %s3233_s5, 256  ;;  %s2439_s10 = scalar_lea.hbm %s3283_s4, 512 }
 0x758   : > { %p2436_p5 = scmp.ne.s32.totalorder %s3233_s5, %s2435_s20  ;;  %p2440_p1 = scmp.lt.u32.totalorder %s3233_s5, %s3283_s4 }
 0x759   : > { %p2441_p3 = scmp.lt.u32.totalorder %s2439_s10, %s2435_s20  ;;  %p2443_p6 = scmp.lt.u32.totalorder %s2435_s20, %s3233_s5 }
 0x75a   : > { %p2437_p7 = pnand %p2436_p5, %p3290_p12 }
 0x75b   : > { %p2442_p11 = por %p2441_p3, %p2440_p1 }
 0x75c   : > { %p2438_p9 = pneg %p2437_p7 }
 0x75d   : > { %p2444_p13 = por %p2443_p6, %p2442_p11 }
 0x75f   : > { %p2445_p8 = pnand %p2444_p13, %p2438_p9 }
 0x761   : > { %2448 = shalt.err (!%p2445_p8)
}
 0x762   : > { %s2497_s26 = smov 128   ;;  %s2498_s29 = smov 8  }
 0x763   : > { %2048 = dma.vmem_to_hbm [thread:$0]  (%p3290_p12), %s3228_s25, 256, %s3233_s5, %s1707_s19, %s2497_s26, %s2497_s26, %s2498_s29  }
 0x764 PF: > { %s1735_s23 = sand.u32 1, %s2475_s15   ;;  %p3291_p10 = scmp.ne.s32.totalorder %s3288_s28, 0 }
 0x765   : > { %p3292_p0 = scmp.ge.s32.totalorder %s2487_s18, 2  ;;  %s1736_s30 = scalar_lea.sflag [#allocation4], %s1735_s23 }
 0x767   : > { %p2055_p2 = pnand %p3292_p0, %p3291_p10 }
 0x769   : > { %2470 = dma.done.wait (!%p2055_p2), %s1736_s30, 256  }
 0x76a   : > { %2472 = vsyncadd (!%p2055_p2), %s1736_s30, 4294967040  ;;  %p17_p4 = scmp.ge.s32.totalorder %s2549_s21, 4   ;;  %s3293_s15 = smov %s2479_s16 }
 0x76b   : > { %s3294_s16 = smov %s2483_s17  ;;  %s3295_s17 = smov %s2561_s24 }
 0x76c   : > { %s3296_s18 = smov %s2549_s21  ;;  %19 = sbr.rel (!%p17_p4) target bundleno = 5 (0x5), region = 84 }
 0x773   :  { %1741 = vsyncpa [#allocation3], 1 }
 0x774   :  { %1743 = vsyncpa [#allocation3 + $0x1], 1 }
 0x775   :  { %1744 = vsyncpa [#allocation4], 1 }
 0x776   :  { %1746 = vsyncpa [#allocation4 + $0x1], 1 }

</bundles_post_ra>
